<compile_context>
chip_gen: v7x
topology: tpu7x:2x2x1
jax: 0.10.0
libtpu: 0.0.40
codegen_flags: <defaults>
</compile_context>

<pallas_src>
import functools

import jax
import jax.numpy as jnp
from jax import lax
from jax.experimental import pallas as pl
from jax.experimental.pallas import tpu as pltpu


def _round_up(x, m):
    return (x + m - 1) // m * m


# ----------------------------- fused residual-block kernel -----------------------------

def _fused_block_kernel(mask_ref, x_ref, res_ref,
                        w1_ref, sh1_ref, w2_ref, sh2_ref,
                        wq_ref, bq_ref, wk_ref, bk_ref, wv_ref, bv_ref, gamma_ref,
                        o_ref, stack_ref, int_ref, *,
                        cin, cq, h, w, wp, s, off, l1, l2):
    hw = h * w
    xf = x_ref[0]            # (C, Lf) zero-guarded, zero-padded flat image
    res = res_ref[0]         # (C, HW) original input (residual)

    # flat shifts of the 9 taps of a 3x3 kernel in (Hp, Wp)-flattened coordinates
    shifts = [(dy - 1) * wp + (dx - 1) for dy in range(3) for dx in range(3)]

    # --- conv1 + BN1 + ReLU: build (9*C, l1) tap stack, ONE K=9*C MXU matmul ---
    for t, sh in enumerate(shifts):
        a = off - s + sh
        stack_ref[pl.ds(t * cin, cin), :] = xf[:, a:a + l1]
    acc1 = jnp.dot(w1_ref[...], stack_ref[...], preferred_element_type=jnp.float32)
    # interior mask reproduces conv2's zero padding exactly (ring + out-of-frame -> 0)
    t1 = jnp.maximum(acc1 + sh1_ref[...], 0.0) * mask_ref[...]          # (C, l1)

    # --- conv2 + BN2 over the padded frame (ring outputs are discarded below) ---
    for t, sh in enumerate(shifts):
        stack_ref[pl.ds(t * cin, cin), pl.ds(0, l2)] = (
            t1[:, s + sh:s + sh + l2].astype(stack_ref.dtype))
    acc2 = jnp.dot(w1_ref.dtype.type(1) * w2_ref[...], stack_ref[:, pl.ds(0, l2)],
                   preferred_element_type=jnp.float32)
    t2 = acc2 + sh2_ref[...]                                            # (C, l2)

    # --- interior extraction: padded (Hp, Wp) frame -> contiguous (H*W) lanes ---
    for hh in range(h):
        src = (hh + 1) * wp + 1
        int_ref[:, pl.ds(hh * w, w)] = t2[:, src:src + w]
    y = int_ref[...]                                                    # (C, HW) f32

    # --- self-attention (1x1 projections) + gamma*out + y + residual, ReLU ---
    # qT[n, i] = sum_c y[c, n] * wq[i, c] + bq[i]   (query already "transposed")
    qT = lax.dot_general(y, wq_ref[...], (((0,), (1,)), ((), ())),
                         preferred_element_type=jnp.float32) + bq_ref[...]   # (HW, Cq)
    k = jnp.dot(wk_ref[...], y, preferred_element_type=jnp.float32) + bk_ref[...]  # (Cq, HW)
    v = jnp.dot(wv_ref[...], y, preferred_element_type=jnp.float32) + bv_ref[...]  # (C,  HW)
    scale = 1.0 / (cq ** 0.5)
    if cq == 1:
        # K=1 contraction -> VPU broadcast outer product instead of an MXU pass
        energy = (qT * k) * scale                                       # (HW, HW)
    else:
        energy = lax.dot_general(qT, k, (((1,), (0,)), ((), ())),
                                 preferred_element_type=jnp.float32) * scale
    m = jnp.max(energy, axis=-1, keepdims=True)
    p = jnp.exp(energy - m)
    attn = p * pl.reciprocal(jnp.sum(p, axis=-1, keepdims=True), approx=True)
    # out[c, n] = sum_m v[c, m] * attn[n, m]   (== torch.bmm(v, attn^T)); no explicit .T
    out = lax.dot_general(v, attn, (((1,), (1,)), ((), ())),
                          preferred_element_type=jnp.float32)           # (C, HW)
    o_ref[0] = jnp.maximum(gamma_ref[...] * out + y + res, 0.0).astype(o_ref.dtype)


# --------------------------------------- forward ---------------------------------------

def residual_block_forward(x, p, *, mxu_dtype=jnp.float32):
    # mxu_dtype=jnp.bfloat16 halves conv-operand HBM/VMEM traffic and doubles MXU rate
    # on v6e/v7x (epilogue & attention stay f32); default f32 for exact verification.
    B, C, H, W = x.shape
    Hp, Wp = H + 2, W + 2
    HW = H * W
    L2 = Hp * Wp                         # padded frame size
    S = Wp + 1                           # max |flat shift| of a 3x3 tap
    L1 = L2 + 2 * S                      # conv1 extent (includes conv2 halo)
    off = 2 * S                          # front guard so every tap read is in-bounds
    Lf = _round_up(off + L1, 128)        # per-image flat slab width
    Cq = p["wq"].shape[0]

    # ---- host-side layout prep: one pad + scatter into a zero-guarded flat slab ----
    xpad = jnp.pad(x, ((0, 0), (0, 0), (1, 1), (1, 1)))                 # (B, C, Hp, Wp)
    xflat = jnp.zeros((B, C, Lf), mxu_dtype).at[:, :, off:off + L2].set(
        xpad.reshape(B, C, L2).astype(mxu_dtype))
    res = x.reshape(B, C, HW)

    # single-row interior mask (constant across grid, 1.4 KB; replaces the old C-wide mask DMA)
    ring = jnp.zeros((Hp, Wp), jnp.float32).at[1:-1, 1:-1].set(1.0)
    mask = jnp.zeros((1, L1), jnp.float32).at[:, S:S + L2].set(ring.reshape(1, L2))

    # fold conv bias + eval-mode BN into lane-dense (C, 9*C) tap weights and one shift
    w1t = (jnp.transpose(p["w1"], (0, 2, 3, 1)).reshape(C, 9 * C)
           * p["bn1_scale"][:, None]).astype(mxu_dtype)
    w2t = (jnp.transpose(p["w2"], (0, 2, 3, 1)).reshape(C, 9 * C)
           * p["bn2_scale"][:, None]).astype(mxu_dtype)
    sh1 = (p["bn1_scale"] * p["b1"] + p["bn1_shift"]).reshape(C, 1)
    sh2 = (p["bn2_scale"] * p["b2"] + p["bn2_shift"]).reshape(C, 1)

    kernel = functools.partial(_fused_block_kernel, cin=C, cq=Cq, h=H, w=W,
                               wp=Wp, s=S, off=off, l1=L1, l2=L2)
    out = pl.pallas_call(
        kernel,
        out_shape=jax.ShapeDtypeStruct((B, C, HW), jnp.float32),
        grid=(B,),
        in_specs=[
            pl.BlockSpec((1, L1), lambda b: (0, 0)),                    # interior mask row
            pl.BlockSpec((1, C, Lf), lambda b: (b, 0, 0)),              # padded flat image
            pl.BlockSpec((1, C, HW), lambda b: (b, 0, 0)),              # residual
            pl.BlockSpec((C, 9 * C), lambda b: (0, 0)),                 # folded conv1 taps
            pl.BlockSpec((C, 1), lambda b: (0, 0)),                     # shift1
            pl.BlockSpec((C, 9 * C), lambda b: (0, 0)),                 # folded conv2 taps
            pl.BlockSpec((C, 1), lambda b: (0, 0)),                     # shift2
            pl.BlockSpec((Cq, C), lambda b: (0, 0)),                    # wq
            pl.BlockSpec((1, Cq), lambda b: (0, 0)),                    # bq (row for qT)
            pl.BlockSpec((Cq, C), lambda b: (0, 0)),                    # wk
            pl.BlockSpec((Cq, 1), lambda b: (0, 0)),                    # bk
            pl.BlockSpec((C, C), lambda b: (0, 0)),                     # wv
            pl.BlockSpec((C, 1), lambda b: (0, 0)),                     # bv
            pl.BlockSpec((1, 1), lambda b: (0, 0)),                     # gamma
        ],
        out_specs=pl.BlockSpec((1, C, HW), lambda b: (b, 0, 0)),        # lane-dense, batch-major
        scratch_shapes=[pltpu.VMEM((9 * C, L1), mxu_dtype),             # im2col tap stack
                        pltpu.VMEM((C, HW), jnp.float32)],              # interior slab
        compiler_params=pltpu.CompilerParams(
            dimension_semantics=("parallel",),
            vmem_limit_bytes=32 * 1024 * 1024),
    )(mask, xflat, res,
      w1t, sh1, w2t, sh2,
      p["wq"], p["bq"].reshape(1, Cq), p["wk"], p["bk"].reshape(Cq, 1),
      p["wv"], p["bv"].reshape(C, 1), p["gamma"].reshape(1, 1))
    return out.reshape(B, C, H, W)                                      # free reshape, no copy


# --------------------------------- pure-JAX reference ----------------------------------

def _ref_forward(x, p):
    def conv(x, w, b):
        y = lax.conv_general_dilated(x, w, (1, 1), ((1, 1), (1, 1)),
                                     dimension_numbers=("NCHW", "OIHW", "NCHW"))
        return y + b[None, :, None, None]

    def bn(x, s, t):
        return x * s[None, :, None, None] + t[None, :, None, None]

    out = jax.nn.relu(bn(conv(x, p["w1"], p["b1"]), p["bn1_scale"], p["bn1_shift"]))
    out = bn(conv(out, p["w2"], p["b2"]), p["bn2_scale"], p["bn2_shift"])
    B, C, H, W = out.shape
    xf = out.reshape(B, C, H * W)
    q = jnp.einsum("qc,bcn->bqn", p["wq"], xf) + p["bq"][None, :, None]
    k = jnp.einsum("qc,bcn->bqn", p["wk"], xf) + p["bk"][None, :, None]
    v = jnp.einsum("vc,bcn->bvn", p["wv"], xf) + p["bv"][None, :, None]
    energy = jnp.einsum("bqn,bqm->bnm", q, k) / (q.shape[1] ** 0.5)
    attn = jax.nn.softmax(energy, axis=-1)
    o = jnp.einsum("bvm,bnm->bvn", v, attn)
    a = (p["gamma"].reshape(()) * o + xf).reshape(B, C, H, W)
    return jax.nn.relu(a + x)


# ------------------------------------------ main ---------------------------------------

if __name__ == "__main__":
    B, C, H, W = 2, 8, 16, 16        # channels=8 so that channels // 8 >= 1
    eps = 1e-5
    Cq = C // 8

    key = jax.random.PRNGKey(0)
    ks = jax.random.split(key, 20)

    # eval-mode BatchNorm: fold (weight, bias, running_mean, running_var) -> scale/shift
    def bn_fold(kw, kb, km, kv):
        weight = 1.0 + 0.1 * jax.random.normal(kw, (C,), jnp.float32)
        bias = 0.1 * jax.random.normal(kb, (C,), jnp.float32)
        mean = 0.1 * jax.random.normal(km, (C,), jnp.float32)
        var = 1.0 + 0.1 * jax.random.normal(kv, (C,), jnp.float32) ** 2
        scale = weight / jnp.sqrt(var + eps)
        shift = bias - mean * scale
        return scale, shift

    bn1_scale, bn1_shift = bn_fold(ks[10], ks[11], ks[12], ks[13])
    bn2_scale, bn2_shift = bn_fold(ks[14], ks[15], ks[16], ks[17])

    params = {
        "w1": jax.random.normal(ks[0], (C, C, 3, 3), jnp.float32) * 0.1,
        "b1": jax.random.normal(ks[1], (C,), jnp.float32) * 0.1,
        "w2": jax.random.normal(ks[2], (C, C, 3, 3), jnp.float32) * 0.1,
        "b2": jax.random.normal(ks[3], (C,), jnp.float32) * 0.1,
        "bn1_scale": bn1_scale, "bn1_shift": bn1_shift,
        "bn2_scale": bn2_scale, "bn2_shift": bn2_shift,
        # 1x1-conv projections of SelfAttention2D reshaped to matrices
        "wq": jax.random.normal(ks[4], (Cq, C), jnp.float32) * 0.1,
        "bq": jax.random.normal(ks[5], (Cq,), jnp.float32) * 0.1,
        "wk": jax.random.normal(ks[6], (Cq, C), jnp.float32) * 0.1,
        "bk": jax.random.normal(ks[7], (Cq,), jnp.float32) * 0.1,
        "wv": jax.random.normal(ks[8], (C, C), jnp.float32) * 0.1,
        "bv": jax.random.normal(ks[9], (C,), jnp.float32) * 0.1,
        # __init__ uses gamma = zeros(1); use a nonzero value so the attention path
        # is actually exercised.
        "gamma": jnp.array([0.5], jnp.float32),
    }

    x = jax.random.normal(ks[18], (B, C, H, W), jnp.float32)

    out = jax.block_until_ready(jax.jit(residual_block_forward)(x, params))
    ref = _ref_forward(x, params)

    assert out.shape == (B, C, H, W)
    # tolerance slightly looser than f32 exactness: the softmax denominator uses the
    # approximate (EUP) reciprocal and the 9-tap fusion reorders f32 accumulation.
    assert jnp.allclose(out, ref, rtol=1e-3, atol=1e-3), \
        f"mismatch: max abs err = {jnp.max(jnp.abs(out - ref))}"

    print("KERNEL_OK")
</pallas_src>

<mosaic_0001>
module attributes {stable_mosaic.version = 11 : i64} {
  func.func @_fused_block_kernel(%arg0: i32, %arg1: memref<1x362xf32, #tpu.memory_space<vmem>>, %arg2: memref<1x8x512xf32, #tpu.memory_space<vmem>>, %arg3: memref<1x8x256xf32, #tpu.memory_space<vmem>>, %arg4: memref<8x72xf32, #tpu.memory_space<vmem>>, %arg5: memref<8x1xf32, #tpu.memory_space<vmem>>, %arg6: memref<8x72xf32, #tpu.memory_space<vmem>>, %arg7: memref<8x1xf32, #tpu.memory_space<vmem>>, %arg8: memref<1x8xf32, #tpu.memory_space<vmem>>, %arg9: memref<1x1xf32, #tpu.memory_space<vmem>>, %arg10: memref<1x8xf32, #tpu.memory_space<vmem>>, %arg11: memref<1x1xf32, #tpu.memory_space<vmem>>, %arg12: memref<8x8xf32, #tpu.memory_space<vmem>>, %arg13: memref<8x1xf32, #tpu.memory_space<vmem>>, %arg14: memref<1x1xf32, #tpu.memory_space<vmem>>, %arg15: memref<1x8x256xf32, #tpu.memory_space<vmem>>, %arg16: memref<72x362xf32, #tpu.memory_space<vmem>>, %arg17: memref<8x256xf32, #tpu.memory_space<vmem>>) attributes {dimension_semantics = [#tpu.dimension_semantics<parallel>], iteration_bounds = array<i64: 2>, scalar_prefetch = 0 : i64, scratch_operands = 2 : i64, tpu.core_type = #tpu.core_type<tc>, window_params = [{pipeline_mode = #tpu.pipeline_mode<synchronous>, transform_indices = @transform_0, window_bounds = array<i64: 1, 362>}, {transform_indices = @transform_1, window_bounds = array<i64: 1, 8, 512>}, {transform_indices = @transform_2, window_bounds = array<i64: 1, 8, 256>}, {pipeline_mode = #tpu.pipeline_mode<synchronous>, transform_indices = @transform_3, window_bounds = array<i64: 8, 72>}, {pipeline_mode = #tpu.pipeline_mode<synchronous>, transform_indices = @transform_4, window_bounds = array<i64: 8, 1>}, {pipeline_mode = #tpu.pipeline_mode<synchronous>, transform_indices = @transform_5, window_bounds = array<i64: 8, 72>}, {pipeline_mode = #tpu.pipeline_mode<synchronous>, transform_indices = @transform_6, window_bounds = array<i64: 8, 1>}, {pipeline_mode = #tpu.pipeline_mode<synchronous>, transform_indices = @transform_7, window_bounds = array<i64: 1, 8>}, {pipeline_mode = #tpu.pipeline_mode<synchronous>, transform_indices = @transform_8, window_bounds = array<i64: 1, 1>}, {pipeline_mode = #tpu.pipeline_mode<synchronous>, transform_indices = @transform_9, window_bounds = array<i64: 1, 8>}, {pipeline_mode = #tpu.pipeline_mode<synchronous>, transform_indices = @transform_10, window_bounds = array<i64: 1, 1>}, {pipeline_mode = #tpu.pipeline_mode<synchronous>, transform_indices = @transform_11, window_bounds = array<i64: 8, 8>}, {pipeline_mode = #tpu.pipeline_mode<synchronous>, transform_indices = @transform_12, window_bounds = array<i64: 8, 1>}, {pipeline_mode = #tpu.pipeline_mode<synchronous>, transform_indices = @transform_13, window_bounds = array<i64: 1, 1>}, {transform_indices = @transform_14, window_bounds = array<i64: 1, 8, 256>}]} {
    %c0 = arith.constant 0 : index
    %c0_0 = arith.constant 0 : index
    %c0_1 = arith.constant 0 : index
    %0 = vector.load %arg2[%c0, %c0_0, %c0_1] : memref<1x8x512xf32, #tpu.memory_space<vmem>>, vector<1x8x512xf32>
    %1 = vector.shape_cast %0 : vector<1x8x512xf32> to vector<8x512xf32>
    %c0_2 = arith.constant 0 : index
    %c0_3 = arith.constant 0 : index
    %c0_4 = arith.constant 0 : index
    %2 = vector.load %arg3[%c0_2, %c0_3, %c0_4] : memref<1x8x256xf32, #tpu.memory_space<vmem>>, vector<1x8x256xf32>
    %3 = vector.shape_cast %2 : vector<1x8x256xf32> to vector<8x256xf32>
    %4 = vector.extract_strided_slice %1 {offsets = [0, 0], sizes = [8, 362], strides = [1, 1]} : vector<8x512xf32> to vector<8x362xf32>
    %c0_5 = arith.constant 0 : index
    %c0_6 = arith.constant 0 : index
    %5 = vector.load %arg16[%c0_5, %c0_6] : memref<72x362xf32, #tpu.memory_space<vmem>>, vector<8x362xf32>
    tpu.vector_store %arg16[%c0_5, %c0_6], %4 {strides = array<i32>} : memref<72x362xf32, #tpu.memory_space<vmem>>, vector<8x362xf32>,
    %6 = vector.extract_strided_slice %1 {offsets = [0, 1], sizes = [8, 362], strides = [1, 1]} : vector<8x512xf32> to vector<8x362xf32>
    %c8 = arith.constant 8 : index
    %c0_7 = arith.constant 0 : index
    %7 = vector.load %arg16[%c8, %c0_7] : memref<72x362xf32, #tpu.memory_space<vmem>>, vector<8x362xf32>
    tpu.vector_store %arg16[%c8, %c0_7], %6 {strides = array<i32>} : memref<72x362xf32, #tpu.memory_space<vmem>>, vector<8x362xf32>,
    %8 = vector.extract_strided_slice %1 {offsets = [0, 2], sizes = [8, 362], strides = [1, 1]} : vector<8x512xf32> to vector<8x362xf32>
    %c16 = arith.constant 16 : index
    %c0_8 = arith.constant 0 : index
    %9 = vector.load %arg16[%c16, %c0_8] : memref<72x362xf32, #tpu.memory_space<vmem>>, vector<8x362xf32>
    tpu.vector_store %arg16[%c16, %c0_8], %8 {strides = array<i32>} : memref<72x362xf32, #tpu.memory_space<vmem>>, vector<8x362xf32>,
    %10 = vector.extract_strided_slice %1 {offsets = [0, 18], sizes = [8, 362], strides = [1, 1]} : vector<8x512xf32> to vector<8x362xf32>
    %c24 = arith.constant 24 : index
    %c0_9 = arith.constant 0 : index
    %11 = vector.load %arg16[%c24, %c0_9] : memref<72x362xf32, #tpu.memory_space<vmem>>, vector<8x362xf32>
    tpu.vector_store %arg16[%c24, %c0_9], %10 {strides = array<i32>} : memref<72x362xf32, #tpu.memory_space<vmem>>, vector<8x362xf32>,
    %12 = vector.extract_strided_slice %1 {offsets = [0, 19], sizes = [8, 362], strides = [1, 1]} : vector<8x512xf32> to vector<8x362xf32>
    %c32 = arith.constant 32 : index
    %c0_10 = arith.constant 0 : index
    %13 = vector.load %arg16[%c32, %c0_10] : memref<72x362xf32, #tpu.memory_space<vmem>>, vector<8x362xf32>
    tpu.vector_store %arg16[%c32, %c0_10], %12 {strides = array<i32>} : memref<72x362xf32, #tpu.memory_space<vmem>>, vector<8x362xf32>,
    %14 = vector.extract_strided_slice %1 {offsets = [0, 20], sizes = [8, 362], strides = [1, 1]} : vector<8x512xf32> to vector<8x362xf32>
    %c40 = arith.constant 40 : index
    %c0_11 = arith.constant 0 : index
    %15 = vector.load %arg16[%c40, %c0_11] : memref<72x362xf32, #tpu.memory_space<vmem>>, vector<8x362xf32>
    tpu.vector_store %arg16[%c40, %c0_11], %14 {strides = array<i32>} : memref<72x362xf32, #tpu.memory_space<vmem>>, vector<8x362xf32>,
    %16 = vector.extract_strided_slice %1 {offsets = [0, 36], sizes = [8, 362], strides = [1, 1]} : vector<8x512xf32> to vector<8x362xf32>
    %c48 = arith.constant 48 : index
    %c0_12 = arith.constant 0 : index
    %17 = vector.load %arg16[%c48, %c0_12] : memref<72x362xf32, #tpu.memory_space<vmem>>, vector<8x362xf32>
    tpu.vector_store %arg16[%c48, %c0_12], %16 {strides = array<i32>} : memref<72x362xf32, #tpu.memory_space<vmem>>, vector<8x362xf32>,
    %18 = vector.extract_strided_slice %1 {offsets = [0, 37], sizes = [8, 362], strides = [1, 1]} : vector<8x512xf32> to vector<8x362xf32>
    %c56 = arith.constant 56 : index
    %c0_13 = arith.constant 0 : index
    %19 = vector.load %arg16[%c56, %c0_13] : memref<72x362xf32, #tpu.memory_space<vmem>>, vector<8x362xf32>
    tpu.vector_store %arg16[%c56, %c0_13], %18 {strides = array<i32>} : memref<72x362xf32, #tpu.memory_space<vmem>>, vector<8x362xf32>,
    %20 = vector.extract_strided_slice %1 {offsets = [0, 38], sizes = [8, 362], strides = [1, 1]} : vector<8x512xf32> to vector<8x362xf32>
    %c64 = arith.constant 64 : index
    %c0_14 = arith.constant 0 : index
    %21 = vector.load %arg16[%c64, %c0_14] : memref<72x362xf32, #tpu.memory_space<vmem>>, vector<8x362xf32>
    tpu.vector_store %arg16[%c64, %c0_14], %20 {strides = array<i32>} : memref<72x362xf32, #tpu.memory_space<vmem>>, vector<8x362xf32>,
    %c0_15 = arith.constant 0 : index
    %c0_16 = arith.constant 0 : index
    %22 = vector.load %arg4[%c0_15, %c0_16] : memref<8x72xf32, #tpu.memory_space<vmem>>, vector<8x72xf32>
    %c0_17 = arith.constant 0 : index
    %c0_18 = arith.constant 0 : index
    %23 = vector.load %arg16[%c0_17, %c0_18] : memref<72x362xf32, #tpu.memory_space<vmem>>, vector<72x362xf32>
    %cst = arith.constant dense<0.000000e+00> : vector<8x362xf32>
    %24 = tpu.matmul %22, %23, %cst {dimension_numbers = #tpu.dot_dimension_numbers<[1], [0], [0], [1], [0, 0, 1, 1], [], []>} : vector<8x72xf32>, vector<72x362xf32>, vector<8x362xf32> -> vector<8x362xf32>
    %c0_19 = arith.constant 0 : index
    %c0_20 = arith.constant 0 : index
    %25 = vector.load %arg5[%c0_19, %c0_20] : memref<8x1xf32, #tpu.memory_space<vmem>>, vector<8x1xf32>
    %26 = vector.broadcast %25 : vector<8x1xf32> to vector<8x362xf32>
    %27 = arith.addf %24, %26 : vector<8x362xf32>
    %cst_21 = arith.constant 0.000000e+00 : f32
    %28 = vector.broadcast %cst_21 : f32 to vector<8x362xf32>
    %29 = arith.maximumf %27, %28 : vector<8x362xf32>
    %c0_22 = arith.constant 0 : index
    %c0_23 = arith.constant 0 : index
    %30 = vector.load %arg1[%c0_22, %c0_23] : memref<1x362xf32, #tpu.memory_space<vmem>>, vector<1x362xf32>
    %31 = vector.broadcast %30 : vector<1x362xf32> to vector<8x362xf32>
    %32 = arith.mulf %29, %31 : vector<8x362xf32>
    %33 = vector.extract_strided_slice %32 {offsets = [0, 0], sizes = [8, 324], strides = [1, 1]} : vector<8x362xf32> to vector<8x324xf32>
    %c0_24 = arith.constant 0 : index
    %c0_25 = arith.constant 0 : index
    %34 = vector.load %arg16[%c0_24, %c0_25] : memref<72x362xf32, #tpu.memory_space<vmem>>, vector<8x324xf32>
    tpu.vector_store %arg16[%c0_24, %c0_25], %33 {strides = array<i32>} : memref<72x362xf32, #tpu.memory_space<vmem>>, vector<8x324xf32>,
    %35 = vector.extract_strided_slice %32 {offsets = [0, 1], sizes = [8, 324], strides = [1, 1]} : vector<8x362xf32> to vector<8x324xf32>
    %c8_26 = arith.constant 8 : index
    %c0_27 = arith.constant 0 : index
    %36 = vector.load %arg16[%c8_26, %c0_27] : memref<72x362xf32, #tpu.memory_space<vmem>>, vector<8x324xf32>
    tpu.vector_store %arg16[%c8_26, %c0_27], %35 {strides = array<i32>} : memref<72x362xf32, #tpu.memory_space<vmem>>, vector<8x324xf32>,
    %37 = vector.extract_strided_slice %32 {offsets = [0, 2], sizes = [8, 324], strides = [1, 1]} : vector<8x362xf32> to vector<8x324xf32>
    %c16_28 = arith.constant 16 : index
    %c0_29 = arith.constant 0 : index
    %38 = vector.load %arg16[%c16_28, %c0_29] : memref<72x362xf32, #tpu.memory_space<vmem>>, vector<8x324xf32>
    tpu.vector_store %arg16[%c16_28, %c0_29], %37 {strides = array<i32>} : memref<72x362xf32, #tpu.memory_space<vmem>>, vector<8x324xf32>,
    %39 = vector.extract_strided_slice %32 {offsets = [0, 18], sizes = [8, 324], strides = [1, 1]} : vector<8x362xf32> to vector<8x324xf32>
    %c24_30 = arith.constant 24 : index
    %c0_31 = arith.constant 0 : index
    %40 = vector.load %arg16[%c24_30, %c0_31] : memref<72x362xf32, #tpu.memory_space<vmem>>, vector<8x324xf32>
    tpu.vector_store %arg16[%c24_30, %c0_31], %39 {strides = array<i32>} : memref<72x362xf32, #tpu.memory_space<vmem>>, vector<8x324xf32>,
    %41 = vector.extract_strided_slice %32 {offsets = [0, 19], sizes = [8, 324], strides = [1, 1]} : vector<8x362xf32> to vector<8x324xf32>
    %c32_32 = arith.constant 32 : index
    %c0_33 = arith.constant 0 : index
    %42 = vector.load %arg16[%c32_32, %c0_33] : memref<72x362xf32, #tpu.memory_space<vmem>>, vector<8x324xf32>
    tpu.vector_store %arg16[%c32_32, %c0_33], %41 {strides = array<i32>} : memref<72x362xf32, #tpu.memory_space<vmem>>, vector<8x324xf32>,
    %43 = vector.extract_strided_slice %32 {offsets = [0, 20], sizes = [8, 324], strides = [1, 1]} : vector<8x362xf32> to vector<8x324xf32>
    %c40_34 = arith.constant 40 : index
    %c0_35 = arith.constant 0 : index
    %44 = vector.load %arg16[%c40_34, %c0_35] : memref<72x362xf32, #tpu.memory_space<vmem>>, vector<8x324xf32>
    tpu.vector_store %arg16[%c40_34, %c0_35], %43 {strides = array<i32>} : memref<72x362xf32, #tpu.memory_space<vmem>>, vector<8x324xf32>,
    %45 = vector.extract_strided_slice %32 {offsets = [0, 36], sizes = [8, 324], strides = [1, 1]} : vector<8x362xf32> to vector<8x324xf32>
    %c48_36 = arith.constant 48 : index
    %c0_37 = arith.constant 0 : index
    %46 = vector.load %arg16[%c48_36, %c0_37] : memref<72x362xf32, #tpu.memory_space<vmem>>, vector<8x324xf32>
    tpu.vector_store %arg16[%c48_36, %c0_37], %45 {strides = array<i32>} : memref<72x362xf32, #tpu.memory_space<vmem>>, vector<8x324xf32>,
    %47 = vector.extract_strided_slice %32 {offsets = [0, 37], sizes = [8, 324], strides = [1, 1]} : vector<8x362xf32> to vector<8x324xf32>
    %c56_38 = arith.constant 56 : index
    %c0_39 = arith.constant 0 : index
    %48 = vector.load %arg16[%c56_38, %c0_39] : memref<72x362xf32, #tpu.memory_space<vmem>>, vector<8x324xf32>
    tpu.vector_store %arg16[%c56_38, %c0_39], %47 {strides = array<i32>} : memref<72x362xf32, #tpu.memory_space<vmem>>, vector<8x324xf32>,
    %49 = vector.extract_strided_slice %32 {offsets = [0, 38], sizes = [8, 324], strides = [1, 1]} : vector<8x362xf32> to vector<8x324xf32>
    %c64_40 = arith.constant 64 : index
    %c0_41 = arith.constant 0 : index
    %50 = vector.load %arg16[%c64_40, %c0_41] : memref<72x362xf32, #tpu.memory_space<vmem>>, vector<8x324xf32>
    tpu.vector_store %arg16[%c64_40, %c0_41], %49 {strides = array<i32>} : memref<72x362xf32, #tpu.memory_space<vmem>>, vector<8x324xf32>,
    %c0_42 = arith.constant 0 : index
    %c0_43 = arith.constant 0 : index
    %51 = vector.load %arg6[%c0_42, %c0_43] : memref<8x72xf32, #tpu.memory_space<vmem>>, vector<8x72xf32>
    %cst_44 = arith.constant 1.000000e+00 : f32
    %52 = vector.broadcast %cst_44 : f32 to vector<8x72xf32>
    %53 = arith.mulf %52, %51 : vector<8x72xf32>
    %c0_45 = arith.constant 0 : index
    %c0_46 = arith.constant 0 : index
    %54 = vector.load %arg16[%c0_45, %c0_46] : memref<72x362xf32, #tpu.memory_space<vmem>>, vector<72x324xf32>
    %cst_47 = arith.constant dense<0.000000e+00> : vector<8x324xf32>
    %55 = tpu.matmul %53, %54, %cst_47 {dimension_numbers = #tpu.dot_dimension_numbers<[1], [0], [0], [1], [0, 0, 1, 1], [], []>} : vector<8x72xf32>, vector<72x324xf32>, vector<8x324xf32> -> vector<8x324xf32>
    %c0_48 = arith.constant 0 : index
    %c0_49 = arith.constant 0 : index
    %56 = vector.load %arg7[%c0_48, %c0_49] : memref<8x1xf32, #tpu.memory_space<vmem>>, vector<8x1xf32>
    %57 = vector.broadcast %56 : vector<8x1xf32> to vector<8x324xf32>
    %58 = arith.addf %55, %57 : vector<8x324xf32>
    %59 = vector.extract_strided_slice %58 {offsets = [0, 19], sizes = [8, 16], strides = [1, 1]} : vector<8x324xf32> to vector<8x16xf32>
    %c0_50 = arith.constant 0 : index
    %c0_51 = arith.constant 0 : index
    %60 = vector.load %arg17[%c0_50, %c0_51] : memref<8x256xf32, #tpu.memory_space<vmem>>, vector<8x16xf32>
    tpu.vector_store %arg17[%c0_50, %c0_51], %59 {strides = array<i32>} : memref<8x256xf32, #tpu.memory_space<vmem>>, vector<8x16xf32>,
    %61 = vector.extract_strided_slice %58 {offsets = [0, 37], sizes = [8, 16], strides = [1, 1]} : vector<8x324xf32> to vector<8x16xf32>
    %c0_52 = arith.constant 0 : index
    %c16_53 = arith.constant 16 : index
    %62 = vector.load %arg17[%c0_52, %c16_53] : memref<8x256xf32, #tpu.memory_space<vmem>>, vector<8x16xf32>
    tpu.vector_store %arg17[%c0_52, %c16_53], %61 {strides = array<i32>} : memref<8x256xf32, #tpu.memory_space<vmem>>, vector<8x16xf32>,
    %63 = vector.extract_strided_slice %58 {offsets = [0, 55], sizes = [8, 16], strides = [1, 1]} : vector<8x324xf32> to vector<8x16xf32>
    %c0_54 = arith.constant 0 : index
    %c32_55 = arith.constant 32 : index
    %64 = vector.load %arg17[%c0_54, %c32_55] : memref<8x256xf32, #tpu.memory_space<vmem>>, vector<8x16xf32>
    tpu.vector_store %arg17[%c0_54, %c32_55], %63 {strides = array<i32>} : memref<8x256xf32, #tpu.memory_space<vmem>>, vector<8x16xf32>,
    %65 = vector.extract_strided_slice %58 {offsets = [0, 73], sizes = [8, 16], strides = [1, 1]} : vector<8x324xf32> to vector<8x16xf32>
    %c0_56 = arith.constant 0 : index
    %c48_57 = arith.constant 48 : index
    %66 = vector.load %arg17[%c0_56, %c48_57] : memref<8x256xf32, #tpu.memory_space<vmem>>, vector<8x16xf32>
    tpu.vector_store %arg17[%c0_56, %c48_57], %65 {strides = array<i32>} : memref<8x256xf32, #tpu.memory_space<vmem>>, vector<8x16xf32>,
    %67 = vector.extract_strided_slice %58 {offsets = [0, 91], sizes = [8, 16], strides = [1, 1]} : vector<8x324xf32> to vector<8x16xf32>
    %c0_58 = arith.constant 0 : index
    %c64_59 = arith.constant 64 : index
    %68 = vector.load %arg17[%c0_58, %c64_59] : memref<8x256xf32, #tpu.memory_space<vmem>>, vector<8x16xf32>
    tpu.vector_store %arg17[%c0_58, %c64_59], %67 {strides = array<i32>} : memref<8x256xf32, #tpu.memory_space<vmem>>, vector<8x16xf32>,
    %69 = vector.extract_strided_slice %58 {offsets = [0, 109], sizes = [8, 16], strides = [1, 1]} : vector<8x324xf32> to vector<8x16xf32>
    %c0_60 = arith.constant 0 : index
    %c80 = arith.constant 80 : index
    %70 = vector.load %arg17[%c0_60, %c80] : memref<8x256xf32, #tpu.memory_space<vmem>>, vector<8x16xf32>
    tpu.vector_store %arg17[%c0_60, %c80], %69 {strides = array<i32>} : memref<8x256xf32, #tpu.memory_space<vmem>>, vector<8x16xf32>,
    %71 = vector.extract_strided_slice %58 {offsets = [0, 127], sizes = [8, 16], strides = [1, 1]} : vector<8x324xf32> to vector<8x16xf32>
    %c0_61 = arith.constant 0 : index
    %c96 = arith.constant 96 : index
    %72 = vector.load %arg17[%c0_61, %c96] : memref<8x256xf32, #tpu.memory_space<vmem>>, vector<8x16xf32>
    tpu.vector_store %arg17[%c0_61, %c96], %71 {strides = array<i32>} : memref<8x256xf32, #tpu.memory_space<vmem>>, vector<8x16xf32>,
    %73 = vector.extract_strided_slice %58 {offsets = [0, 145], sizes = [8, 16], strides = [1, 1]} : vector<8x324xf32> to vector<8x16xf32>
    %c0_62 = arith.constant 0 : index
    %c112 = arith.constant 112 : index
    %74 = vector.load %arg17[%c0_62, %c112] : memref<8x256xf32, #tpu.memory_space<vmem>>, vector<8x16xf32>
    tpu.vector_store %arg17[%c0_62, %c112], %73 {strides = array<i32>} : memref<8x256xf32, #tpu.memory_space<vmem>>, vector<8x16xf32>,
    %75 = vector.extract_strided_slice %58 {offsets = [0, 163], sizes = [8, 16], strides = [1, 1]} : vector<8x324xf32> to vector<8x16xf32>
    %c0_63 = arith.constant 0 : index
    %c128 = arith.constant 128 : index
    %76 = vector.load %arg17[%c0_63, %c128] : memref<8x256xf32, #tpu.memory_space<vmem>>, vector<8x16xf32>
    tpu.vector_store %arg17[%c0_63, %c128], %75 {strides = array<i32>} : memref<8x256xf32, #tpu.memory_space<vmem>>, vector<8x16xf32>,
    %77 = vector.extract_strided_slice %58 {offsets = [0, 181], sizes = [8, 16], strides = [1, 1]} : vector<8x324xf32> to vector<8x16xf32>
    %c0_64 = arith.constant 0 : index
    %c144 = arith.constant 144 : index
    %78 = vector.load %arg17[%c0_64, %c144] : memref<8x256xf32, #tpu.memory_space<vmem>>, vector<8x16xf32>
    tpu.vector_store %arg17[%c0_64, %c144], %77 {strides = array<i32>} : memref<8x256xf32, #tpu.memory_space<vmem>>, vector<8x16xf32>,
    %79 = vector.extract_strided_slice %58 {offsets = [0, 199], sizes = [8, 16], strides = [1, 1]} : vector<8x324xf32> to vector<8x16xf32>
    %c0_65 = arith.constant 0 : index
    %c160 = arith.constant 160 : index
    %80 = vector.load %arg17[%c0_65, %c160] : memref<8x256xf32, #tpu.memory_space<vmem>>, vector<8x16xf32>
    tpu.vector_store %arg17[%c0_65, %c160], %79 {strides = array<i32>} : memref<8x256xf32, #tpu.memory_space<vmem>>, vector<8x16xf32>,
    %81 = vector.extract_strided_slice %58 {offsets = [0, 217], sizes = [8, 16], strides = [1, 1]} : vector<8x324xf32> to vector<8x16xf32>
    %c0_66 = arith.constant 0 : index
    %c176 = arith.constant 176 : index
    %82 = vector.load %arg17[%c0_66, %c176] : memref<8x256xf32, #tpu.memory_space<vmem>>, vector<8x16xf32>
    tpu.vector_store %arg17[%c0_66, %c176], %81 {strides = array<i32>} : memref<8x256xf32, #tpu.memory_space<vmem>>, vector<8x16xf32>,
    %83 = vector.extract_strided_slice %58 {offsets = [0, 235], sizes = [8, 16], strides = [1, 1]} : vector<8x324xf32> to vector<8x16xf32>
    %c0_67 = arith.constant 0 : index
    %c192 = arith.constant 192 : index
    %84 = vector.load %arg17[%c0_67, %c192] : memref<8x256xf32, #tpu.memory_space<vmem>>, vector<8x16xf32>
    tpu.vector_store %arg17[%c0_67, %c192], %83 {strides = array<i32>} : memref<8x256xf32, #tpu.memory_space<vmem>>, vector<8x16xf32>,
    %85 = vector.extract_strided_slice %58 {offsets = [0, 253], sizes = [8, 16], strides = [1, 1]} : vector<8x324xf32> to vector<8x16xf32>
    %c0_68 = arith.constant 0 : index
    %c208 = arith.constant 208 : index
    %86 = vector.load %arg17[%c0_68, %c208] : memref<8x256xf32, #tpu.memory_space<vmem>>, vector<8x16xf32>
    tpu.vector_store %arg17[%c0_68, %c208], %85 {strides = array<i32>} : memref<8x256xf32, #tpu.memory_space<vmem>>, vector<8x16xf32>,
    %87 = vector.extract_strided_slice %58 {offsets = [0, 271], sizes = [8, 16], strides = [1, 1]} : vector<8x324xf32> to vector<8x16xf32>
    %c0_69 = arith.constant 0 : index
    %c224 = arith.constant 224 : index
    %88 = vector.load %arg17[%c0_69, %c224] : memref<8x256xf32, #tpu.memory_space<vmem>>, vector<8x16xf32>
    tpu.vector_store %arg17[%c0_69, %c224], %87 {strides = array<i32>} : memref<8x256xf32, #tpu.memory_space<vmem>>, vector<8x16xf32>,
    %89 = vector.extract_strided_slice %58 {offsets = [0, 289], sizes = [8, 16], strides = [1, 1]} : vector<8x324xf32> to vector<8x16xf32>
    %c0_70 = arith.constant 0 : index
    %c240 = arith.constant 240 : index
    %90 = vector.load %arg17[%c0_70, %c240] : memref<8x256xf32, #tpu.memory_space<vmem>>, vector<8x16xf32>
    tpu.vector_store %arg17[%c0_70, %c240], %89 {strides = array<i32>} : memref<8x256xf32, #tpu.memory_space<vmem>>, vector<8x16xf32>,
    %c0_71 = arith.constant 0 : index
    %c0_72 = arith.constant 0 : index
    %91 = vector.load %arg17[%c0_71, %c0_72] : memref<8x256xf32, #tpu.memory_space<vmem>>, vector<8x256xf32>
    %c0_73 = arith.constant 0 : index
    %c0_74 = arith.constant 0 : index
    %92 = vector.load %arg8[%c0_73, %c0_74] : memref<1x8xf32, #tpu.memory_space<vmem>>, vector<1x8xf32>
    %cst_75 = arith.constant dense<0.000000e+00> : vector<256x1xf32>
    %93 = tpu.matmul %91, %92, %cst_75 {dimension_numbers = #tpu.dot_dimension_numbers<[0], [1], [1], [0], [0, 1, 1, 0], [], []>} : vector<8x256xf32>, vector<1x8xf32>, vector<256x1xf32> -> vector<256x1xf32>
    %c0_76 = arith.constant 0 : index
    %c0_77 = arith.constant 0 : index
    %94 = vector.load %arg9[%c0_76, %c0_77] : memref<1x1xf32, #tpu.memory_space<vmem>>, vector<1x1xf32>
    %95 = vector.broadcast %94 : vector<1x1xf32> to vector<256x1xf32>
    %96 = arith.addf %93, %95 : vector<256x1xf32>
    %c0_78 = arith.constant 0 : index
    %c0_79 = arith.constant 0 : index
    %97 = vector.load %arg10[%c0_78, %c0_79] : memref<1x8xf32, #tpu.memory_space<vmem>>, vector<1x8xf32>
    %cst_80 = arith.constant dense<0.000000e+00> : vector<1x256xf32>
    %98 = tpu.matmul %97, %91, %cst_80 {dimension_numbers = #tpu.dot_dimension_numbers<[1], [0], [0], [1], [0, 0, 1, 1], [], []>} : vector<1x8xf32>, vector<8x256xf32>, vector<1x256xf32> -> vector<1x256xf32>
    %c0_81 = arith.constant 0 : index
    %c0_82 = arith.constant 0 : index
    %99 = vector.load %arg11[%c0_81, %c0_82] : memref<1x1xf32, #tpu.memory_space<vmem>>, vector<1x1xf32>
    %100 = vector.broadcast %99 : vector<1x1xf32> to vector<1x256xf32>
    %101 = arith.addf %98, %100 : vector<1x256xf32>
    %c0_83 = arith.constant 0 : index
    %c0_84 = arith.constant 0 : index
    %102 = vector.load %arg12[%c0_83, %c0_84] : memref<8x8xf32, #tpu.memory_space<vmem>>, vector<8x8xf32>
    %cst_85 = arith.constant dense<0.000000e+00> : vector<8x256xf32>
    %103 = tpu.matmul %102, %91, %cst_85 {dimension_numbers = #tpu.dot_dimension_numbers<[1], [0], [0], [1], [0, 0, 1, 1], [], []>} : vector<8x8xf32>, vector<8x256xf32>, vector<8x256xf32> -> vector<8x256xf32>
    %c0_86 = arith.constant 0 : index
    %c0_87 = arith.constant 0 : index
    %104 = vector.load %arg13[%c0_86, %c0_87] : memref<8x1xf32, #tpu.memory_space<vmem>>, vector<8x1xf32>
    %105 = vector.broadcast %104 : vector<8x1xf32> to vector<8x256xf32>
    %106 = arith.addf %103, %105 : vector<8x256xf32>
    %107 = vector.broadcast %96 : vector<256x1xf32> to vector<256x256xf32>
    %108 = vector.broadcast %101 : vector<1x256xf32> to vector<256x256xf32>
    %109 = arith.mulf %107, %108 : vector<256x256xf32>
    %cst_88 = arith.constant 1.000000e+00 : f32
    %110 = vector.broadcast %cst_88 : f32 to vector<256x256xf32>
    %111 = arith.mulf %109, %110 : vector<256x256xf32>
    %cst_89 = arith.constant dense<0xFF800000> : vector<256xf32>
    %112 = vector.multi_reduction <maximumf>, %111, %cst_89 [1] : vector<256x256xf32> to vector<256xf32>
    %113 = vector.shape_cast %112 : vector<256xf32> to vector<256x1xf32>
    %114 = vector.broadcast %113 : vector<256x1xf32> to vector<256x256xf32>
    %115 = arith.subf %111, %114 : vector<256x256xf32>
    %116 = math.exp %115 : vector<256x256xf32>
    %cst_90 = arith.constant dense<0.000000e+00> : vector<256xf32>
    %117 = vector.multi_reduction <add>, %116, %cst_90 [1] : vector<256x256xf32> to vector<256xf32>
    %118 = vector.shape_cast %117 : vector<256xf32> to vector<256x1xf32>
    %119 = tpu.reciprocal %118 {approx = true} : vector<256x1xf32> -> vector<256x1xf32>
    %120 = vector.broadcast %119 : vector<256x1xf32> to vector<256x256xf32>
    %121 = arith.mulf %116, %120 : vector<256x256xf32>
    %cst_91 = arith.constant dense<0.000000e+00> : vector<8x256xf32>
    %122 = tpu.matmul %106, %121, %cst_91 {dimension_numbers = #tpu.dot_dimension_numbers<[1], [1], [0], [0], [0, 0, 1, 0], [], []>} : vector<8x256xf32>, vector<256x256xf32>, vector<8x256xf32> -> vector<8x256xf32>
    %c0_92 = arith.constant 0 : index
    %c0_93 = arith.constant 0 : index
    %123 = vector.load %arg14[%c0_92, %c0_93] : memref<1x1xf32, #tpu.memory_space<vmem>>, vector<1x1xf32>
    %124 = vector.broadcast %123 : vector<1x1xf32> to vector<8x256xf32>
    %125 = arith.mulf %124, %122 : vector<8x256xf32>
    %126 = arith.addf %125, %91 : vector<8x256xf32>
    %127 = arith.addf %126, %3 : vector<8x256xf32>
    %cst_94 = arith.constant 0.000000e+00 : f32
    %128 = vector.broadcast %cst_94 : f32 to vector<8x256xf32>
    %129 = arith.maximumf %127, %128 : vector<8x256xf32>
    %c0_95 = arith.constant 0 : index
    %c0_96 = arith.constant 0 : index
    %c0_97 = arith.constant 0 : index
    %130 = vector.load %arg15[%c0_95, %c0_96, %c0_97] : memref<1x8x256xf32, #tpu.memory_space<vmem>>, vector<1x8x256xf32>
    %131 = vector.shape_cast %130 : vector<1x8x256xf32> to vector<8x256xf32>
    %132 = vector.shape_cast %129 : vector<8x256xf32> to vector<1x8x256xf32>
    tpu.vector_store %arg15[%c0_95, %c0_96, %c0_97], %132 {strides = array<i32>} : memref<1x8x256xf32, #tpu.memory_space<vmem>>, vector<1x8x256xf32>,
    return
  }
  func.func @transform_0(%arg0: i32) -> (i32, i32) {
    %c0_i32 = arith.constant 0 : i32
    %c0_i32_0 = arith.constant 0 : i32
    %c0_i32_1 = arith.constant 0 : i32
    return %c0_i32, %c0_i32_0 : i32, i32
  }
  func.func @transform_1(%arg0: i32) -> (i32, i32, i32) {
    %c0_i32 = arith.constant 0 : i32
    %c0_i32_0 = arith.constant 0 : i32
    %c0_i32_1 = arith.constant 0 : i32
    return %arg0, %c0_i32, %c0_i32_0 : i32, i32, i32
  }
  func.func @transform_2(%arg0: i32) -> (i32, i32, i32) {
    %c0_i32 = arith.constant 0 : i32
    %c0_i32_0 = arith.constant 0 : i32
    %c0_i32_1 = arith.constant 0 : i32
    return %arg0, %c0_i32, %c0_i32_0 : i32, i32, i32
  }
  func.func @transform_3(%arg0: i32) -> (i32, i32) {
    %c0_i32 = arith.constant 0 : i32
    %c0_i32_0 = arith.constant 0 : i32
    %c0_i32_1 = arith.constant 0 : i32
    return %c0_i32, %c0_i32_0 : i32, i32
  }
  func.func @transform_4(%arg0: i32) -> (i32, i32) {
    %c0_i32 = arith.constant 0 : i32
    %c0_i32_0 = arith.constant 0 : i32
    %c0_i32_1 = arith.constant 0 : i32
    return %c0_i32, %c0_i32_0 : i32, i32
  }
  func.func @transform_5(%arg0: i32) -> (i32, i32) {
    %c0_i32 = arith.constant 0 : i32
    %c0_i32_0 = arith.constant 0 : i32
    %c0_i32_1 = arith.constant 0 : i32
    return %c0_i32, %c0_i32_0 : i32, i32
  }
  func.func @transform_6(%arg0: i32) -> (i32, i32) {
    %c0_i32 = arith.constant 0 : i32
    %c0_i32_0 = arith.constant 0 : i32
    %c0_i32_1 = arith.constant 0 : i32
    return %c0_i32, %c0_i32_0 : i32, i32
  }
  func.func @transform_7(%arg0: i32) -> (i32, i32) {
    %c0_i32 = arith.constant 0 : i32
    %c0_i32_0 = arith.constant 0 : i32
    %c0_i32_1 = arith.constant 0 : i32
    return %c0_i32, %c0_i32_0 : i32, i32
  }
  func.func @transform_8(%arg0: i32) -> (i32, i32) {
    %c0_i32 = arith.constant 0 : i32
    %c0_i32_0 = arith.constant 0 : i32
    %c0_i32_1 = arith.constant 0 : i32
    return %c0_i32, %c0_i32_0 : i32, i32
  }
  func.func @transform_9(%arg0: i32) -> (i32, i32) {
    %c0_i32 = arith.constant 0 : i32
    %c0_i32_0 = arith.constant 0 : i32
    %c0_i32_1 = arith.constant 0 : i32
    return %c0_i32, %c0_i32_0 : i32, i32
  }
  func.func @transform_10(%arg0: i32) -> (i32, i32) {
    %c0_i32 = arith.constant 0 : i32
    %c0_i32_0 = arith.constant 0 : i32
    %c0_i32_1 = arith.constant 0 : i32
    return %c0_i32, %c0_i32_0 : i32, i32
  }
  func.func @transform_11(%arg0: i32) -> (i32, i32) {
    %c0_i32 = arith.constant 0 : i32
    %c0_i32_0 = arith.constant 0 : i32
    %c0_i32_1 = arith.constant 0 : i32
    return %c0_i32, %c0_i32_0 : i32, i32
  }
  func.func @transform_12(%arg0: i32) -> (i32, i32) {
    %c0_i32 = arith.constant 0 : i32
    %c0_i32_0 = arith.constant 0 : i32
    %c0_i32_1 = arith.constant 0 : i32
    return %c0_i32, %c0_i32_0 : i32, i32
  }
  func.func @transform_13(%arg0: i32) -> (i32, i32) {
    %c0_i32 = arith.constant 0 : i32
    %c0_i32_0 = arith.constant 0 : i32
    %c0_i32_1 = arith.constant 0 : i32
    return %c0_i32, %c0_i32_0 : i32, i32
  }
  func.func @transform_14(%arg0: i32) -> (i32, i32, i32) {
    %c0_i32 = arith.constant 0 : i32
    %c0_i32_0 = arith.constant 0 : i32
    %c0_i32_1 = arith.constant 0 : i32
    return %arg0, %c0_i32, %c0_i32_0 : i32, i32, i32
  }
}

</mosaic_0001>

<bundles_post_ra>
// kernel: residual_block_forward.1
= control target key start
LH: loop header
LB: loop body
LE: loop exit
PB: predicated region body
PF: predicated region fallthrough
CT: control target
= control target key end

     0   :  { %s3324_s19 = smov 0   ;;  %s4237_s0 = inlined_call_operand.vmem [shape: f32[1,362], index: 0, kind: input, shape index: {}]   ;;  %s4238_s1 = inlined_call_operand.vmem [shape: f32[2,8,512], index: 1, kind: input, shape index: {}]   ;;  %s4239_s2 = inlined_call_operand.vmem [shape: f32[2,8,256], index: 2, kind: input, shape index: {}]   ;;  %s4240_s3 = inlined_call_operand.vmem [shape: f32[8,72], index: 3, kind: input, shape index: {}]   ;;  %s4241_s4 = inlined_call_operand.vmem [shape: f32[8,1], index: 4, kind: input, shape index: {}]   ;;  %s4242_s5 = inlined_call_operand.vmem [shape: f32[8,72], index: 5, kind: input, shape index: {}]   ;;  %s4243_s6 = inlined_call_operand.vmem [shape: f32[8,1], index: 6, kind: input, shape index: {}]   ;;  %s4244_s7 = inlined_call_operand.vmem [shape: f32[1,8], index: 7, kind: input, shape index: {}]   ;;  %s4245_s8 = inlined_call_operand.<no memory space> [shape: f32[1,1], index: 8, kind: input, shape index: {}]   ;;  %s4246_s9 = inlined_call_operand.vmem [shape: f32[1,8], index: 9, kind: input, shape index: {}]   ;;  %s4247_s11 = inlined_call_operand.vmem [shape: f32[8,8], index: 11, kind: input, shape index: {}]   ;;  %s4248_s12 = inlined_call_operand.vmem [shape: f32[8,1], index: 12, kind: input, shape index: {}]   ;;  %s4249_s14 = inlined_call_operand.vmem [shape: f32[2,8,256], index: 14, kind: output, shape index: {}]   ;;  %s4250_s10 = inlined_call_operand.<no memory space> [shape: f32[1,1], index: 10, kind: input, shape index: {}]   ;;  %s4251_s13 = inlined_call_operand.<no memory space> [shape: f32[1,1], index: 13, kind: input, shape index: {}]  }
   0x1   :  { %v19_v0 = vstv %s4245_s8  ;;  %v21_v1 = vstv %s4250_s10  ;;  %v23_v2 = vstv %s4251_s13 }
   0x2   :  { %20 = vst [vmem:[#allocation4] sm:$0x1] %v19_v0  ;;  %22 = vst [vmem:[#allocation5] sm:$0x1] %v21_v1 }
   0x3   :  { %24 = vst [vmem:[#allocation6] sm:$0x1] %v23_v2 }
   0x4 LB: > { %s2654_s8 = sadd.s32 4294967295, %s3212_s19   ;;  %p2658_p0 = scmp.ge.s32.totalorder %s3212_s19, 1  ;;  %s3212_s19 = sphi %s3324_s19, %s30_s19  }
   0x5   : > { %p428_p1 = scmp.lt.s32.totalorder %s3212_s19, 3 }
   0x7   : > { %p429_p2 = pnand %p2658_p0, %p428_p1 }
   0x9   : > { %432 = sbr.rel (%p429_p2) target bundleno = 2151 (0x867), region = 76 }
  0x10   : > { %p479_p3 = scmp.lt.s32.totalorder %s2654_s8, 1  ;;  %vm502_vm0 = vcmask 867328   ;;  %s3214_s22 = smov 127   ;;  %v3221_v6 = vmov 0.0   ;;  %v665_v8 = vld [vmem:[%s4241_s4] sm:$0xff]  ;;  %v3223_v9 = vmov 0  }
  0x11   : > { %s3215_s23 = smov 126   ;;  %s3216_s24 = smov 110   ;;  %739 = vmatprep.mubr.f32.mxu1 %v3221_v6  ;;  %3010 = vset.pattern.permute.xlu1 %v3223_v9  ;;  %vm513_vm1 = vcmask 1039360   ;;  %vm528_vm2 = vcmask 1031168   ;;  %vm543_vm3 = vcmask 900096   ;;  %vm558_vm4 = vcmask 891904  }
  0x12   : > { %s4310_s8 = smov (!%p479_p3, %s2654_s8), 1  ;;  %s3217_s25 = smov 109   ;;  %3011 = vset.pattern.permute.xlu0 %v3223_v9  ;;  %vm573_vm5 = vcmask 883712   ;;  %vm591_vm6 = vcmask 752640   ;;  %vm609_vm7 = vcmask 744448   ;;  %vm627_vm8 = vcmask 736256  }
  0x13   : > { %s2708_s10 = sshll.u32 %s4310_s8, 5  ;;  %s3218_s26 = smov 108   ;;  %v637_v59 = vld [vmem:[%s4240_s3] sm:$0xff]  ;;  %vm671_vm9 = vcmask 588800   ;;  %v3224_v2 = vmov 0.0|0.0   ;;  %vm3225_vm10 = vmmov 0  }
  0x14   : > { %s3338_s21 = scalar_lea.vmem %s4238_s1, %s2708_s10  ;;  %s3219_s27 = smov 92   ;;  %vm841_vm11 = vcmask 556032   ;;  %vm1140_vm12 = vcmask 130048   ;;  %vm1145_vm13 = vcmask 261248   ;;  %vm1150_vm14 = vcmask 392448  }
  0x15   : > { %v495_v3 = vld [vmem:[%s3338_s21 + $0x8] sm:$0xff]  ;;  %v494_v4 = vld [vmem:[%s3338_s21] sm:$0xff]  ;;  %v496_v5 = vld [vmem:[%s3338_s21 + $0x10] sm:$0xff]  ;;  %s3220_s28 = smov 91   ;;  %s3222_s29 = smov 90   ;;  %vm1155_vm15 = vcmask 523648  }
  0x16   : > { %509 = vrot.lane.b32.xlu0 %v495_v3, %s3214_s22  ;;  %507 = vrot.lane.b32.xlu1 %v494_v4, %s3214_s22  ;;  %503 = vst.msk [vmem:[#allocation2 + $0x10] sm:$0xff] %vm502_vm0, %v496_v5  ;;  %v497_v7 = vld [vmem:[%s3338_s21 + $0x18] sm:$0xff]  ;;  %s3231_s30 = smov 95   ;;  %s3232_s15 = smov 99  }
  0x17   : > { %s3233_s16 = smov 87   ;;  %s3235_s17 = smov 83  }
  0x18   : > { %s3236_s18 = smov 89   ;;  %s3237_s10 = smov 81  }
  0x19   : > { %s3238_s13 = smov 85   ;;  %s3239_s20 = smov 79  }
  0x1a   : > { %511 = vrot.lane.b32.xlu0 %v496_v5, %s3214_s22  ;;  %524 = vrot.lane.b32.xlu1 %v495_v3, %s3215_s23 }
  0x1d   : > { %v640_v57 = vld [vmem:[#allocation2 + $0x10] sm:$0xff] }
  0x1e   : > { %526 = vrot.lane.b32.xlu0 %v496_v5, %s3215_s23  ;;  %539 = vrot.lane.b32.xlu1 %v495_v3, %s3216_s24 }
  0x22   : > { %541 = vrot.lane.b32.xlu0 %v496_v5, %s3216_s24  ;;  %522 = vrot.lane.b32.xlu1 %v494_v4, %s3215_s23 }
  0x26   : > { %537 = vrot.lane.b32.xlu0 %v494_v4, %s3216_s24  ;;  %554 = vrot.lane.b32.xlu1 %v495_v3, %s3217_s25 }
  0x2a   : > { %556 = vrot.lane.b32.xlu0 %v496_v5, %s3217_s25  ;;  %569 = vrot.lane.b32.xlu1 %v495_v3, %s3218_s26 }
  0x2e   : > { %571 = vrot.lane.b32.xlu0 %v496_v5, %s3218_s26  ;;  %552 = vrot.lane.b32.xlu1 %v494_v4, %s3217_s25 }
  0x32   : > { %567 = vrot.lane.b32.xlu0 %v494_v4, %s3218_s26  ;;  %585 = vrot.lane.b32.xlu1 %v495_v3, %s3219_s27 }
  0x36   : > { %587 = vrot.lane.b32.xlu0 %v496_v5, %s3219_s27  ;;  %603 = vrot.lane.b32.xlu1 %v495_v3, %s3220_s28 }
  0x3a   : > { %605 = vrot.lane.b32.xlu0 %v496_v5, %s3220_s28  ;;  %583 = vrot.lane.b32.xlu1 %v494_v4, %s3219_s27 }
  0x3e   : > { %601 = vrot.lane.b32.xlu0 %v494_v4, %s3220_s28  ;;  %621 = vrot.lane.b32.xlu1 %v495_v3, %s3222_s29 }
  0x42   : > { %623 = vrot.lane.b32.xlu0 %v496_v5, %s3222_s29  ;;  %619 = vrot.lane.b32.xlu1 %v494_v4, %s3222_s29 }
  0x46   : > { %589 = vrot.lane.b32.xlu0 %v497_v7, %s3219_s27  ;;  %607 = vrot.lane.b32.xlu1 %v497_v7, %s3220_s28 }
  0x4a   : > { %625 = vrot.lane.b32.xlu0 %v497_v7, %s3222_s29  ;;  %668 = vperm.xlu1 %3010, %v665_v8  }
  0x88   : > { %v510_v10 = vpop.permute.xlu0 %509  ;;  %v508_v11 = vpop.permute.xlu1 %507 }
  0x89   : > { %v514_v12 = vsel %vm513_vm1, %v508_v11, %v510_v10 }
  0x8a   : > { %v2858_v17 = vpack.c.bf16 %v514_v12, %v494_v4 }
  0x8c   : > { %v512_v13 = vpop.permute.xlu0 %511  ;;  %v525_v14 = vpop.permute.xlu1 %524 }
  0x8d   : > { %v515_v15 = vsel %vm513_vm1, %v510_v10, %v512_v13  ;;  %521 = vst.msk [vmem:[#allocation2 + $0x28] sm:$0xff] %vm502_vm0, %v512_v13 }
  0x8e   : > { %v2856_v16 = vpack.c.bf16 %v515_v15, %v495_v3 }
  0x90   : > { %v527_v18 = vpop.permute.xlu0 %526  ;;  %v540_v19 = vpop.permute.xlu1 %539  ;;  %2857 = vmatprep.subr.bf16.mxu1 %v2856_v16  ;;  %v821_v16 = vlaneseq }
  0x91   : > { %536 = vst.msk [vmem:[#allocation2 + $0x40] sm:$0xff] %vm502_vm0, %v527_v18  ;;  %2859 = vmatpush1.bf16.msra.mxu1 %v2858_v17  ;;  %v530_v22 = vsel %vm528_vm2, %v525_v14, %v527_v18 }
  0x92   : > { %v822_v17 = vshrl.u32 %v821_v16, 7 }
  0x94   : > { %v542_v20 = vpop.permute.xlu0 %541  ;;  %v523_v21 = vpop.permute.xlu1 %522  ;;  %v643_v58 = vld [vmem:[#allocation2 + $0x28] sm:$0xff]  ;;  %v3416_v18 = vsub.s32 0, %v822_v17 }
  0x95   : > { %v545_v23 = vsel %vm543_vm3, %v540_v19, %v542_v20  ;;  %551 = vst.msk [vmem:[#allocation2 + $0x58] sm:$0xff] %vm502_vm0, %v542_v20  ;;  %v529_v27 = vsel %vm528_vm2, %v523_v21, %v525_v14  ;;  %v2873_v63 = vpack.c.bf16 %v643_v58, %v640_v57  ;;  %v819_v20 = vld [vmem:[%s4237_s0] sm:$0x7]  ;;  %v827_v21 = vsub.s32 1, %v822_v17 }
  0x96   : > { %v2860_v24 = vpack.c.bf16 %v545_v23, %v530_v22 }
  0x98   : > { %v538_v25 = vpop.permute.xlu0 %537  ;;  %v555_v26 = vpop.permute.xlu1 %554  ;;  %2861 = vmatprep.subr.bf16.mxu1 %v2860_v24  ;;  %v646_v4 = vld [vmem:[#allocation2 + $0x40] sm:$0xff]  ;;  %v824_v24 = vrot.slane %v819_v20, %v3416_v18 }
  0x99   : > { %v544_v28 = vsel %vm543_vm3, %v538_v25, %v540_v19 }
  0x9a   : > { %v2862_v29 = vpack.c.bf16 %v544_v28, %v529_v27  ;;  %v828_v27 = vrot.slane %v819_v20, %v827_v21 }
  0x9c   : > { %v557_v30 = vpop.permute.xlu0 %556  ;;  %v570_v31 = vpop.permute.xlu1 %569  ;;  %2863 = vmatpush1.bf16.msra.mxu1 %v2862_v29  ;;  %v649_v3 = vld [vmem:[#allocation2 + $0x58] sm:$0xff] }
  0x9d   : > { %566 = vst.msk [vmem:[#allocation2 + $0x70] sm:$0xff] %vm502_vm0, %v557_v30  ;;  %v560_v34 = vsel %vm558_vm4, %v555_v26, %v557_v30  ;;  %v2876_v7 = vpack.c.bf16 %v649_v3, %v646_v4 }
  0xa0   : > { %v572_v32 = vpop.permute.xlu0 %571  ;;  %v553_v33 = vpop.permute.xlu1 %552 }
  0xa1   : > { %v575_v35 = vsel %vm573_vm5, %v570_v31, %v572_v32  ;;  %581 = vst.msk [vmem:[#allocation2 + $0x88] sm:$0xff] %vm502_vm0, %v572_v32  ;;  %v559_v39 = vsel %vm558_vm4, %v553_v33, %v555_v26  ;;  %v831_v32 = vsub.s32 2, %v822_v17 }
  0xa2   : > { %v2864_v36 = vpack.c.bf16 %v575_v35, %v560_v34 }
  0xa3   : > { %v832_v35 = vrot.slane %v819_v20, %v831_v32 }
  0xa4   : > { %v568_v37 = vpop.permute.xlu0 %567  ;;  %v586_v38 = vpop.permute.xlu1 %585  ;;  %2865 = vmatprep.subr.bf16.mxu1 %v2864_v36  ;;  %v652_v10 = vld [vmem:[#allocation2 + $0x70] sm:$0xff] }
  0xa5   : > { %v574_v40 = vsel %vm573_vm5, %v568_v37, %v570_v31 }
  0xa6   : > { %v2866_v41 = vpack.c.bf16 %v574_v40, %v559_v39  ;;  %v986_v39 = vld [vmem:[%s4243_s6] sm:$0xff] }
  0xa8   : > { %v588_v42 = vpop.permute.xlu0 %587  ;;  %v604_v43 = vpop.permute.xlu1 %603  ;;  %2867 = vmatpush1.bf16.msra.mxu1 %v2866_v41  ;;  %v655_v9 = vld [vmem:[#allocation2 + $0x88] sm:$0xff] }
  0xa9   : > { %v593_v46 = vsel %vm591_vm6, %v586_v38, %v588_v42  ;;  %v2879_v11 = vpack.c.bf16 %v655_v9, %v652_v10 }
  0xac   : > { %v606_v44 = vpop.permute.xlu0 %605  ;;  %v584_v45 = vpop.permute.xlu1 %583 }
  0xad   : > { %v611_v47 = vsel %vm609_vm7, %v604_v43, %v606_v44  ;;  %v592_v51 = vsel %vm591_vm6, %v584_v45, %v586_v38 }
  0xae   : > { %v2868_v48 = vpack.c.bf16 %v611_v47, %v593_v46 }
  0xb0   : > { %v602_v49 = vpop.permute.xlu0 %601  ;;  %v622_v50 = vpop.permute.xlu1 %621  ;;  %2869 = vmatprep.subr.bf16.mxu1 %v2868_v48 }
  0xb1   : > { %v610_v52 = vsel %vm609_vm7, %v602_v49, %v604_v43 }
  0xb2   : > { %v2870_v53 = vpack.c.bf16 %v610_v52, %v592_v51 }
  0xb4   : > { %v624_v54 = vpop.permute.xlu0 %623  ;;  %v620_v55 = vpop.permute.xlu1 %619  ;;  %2871 = vmatpush1.bf16.msra.mxu1 %v2870_v53 }
  0xb5   : > { %v629_v56 = vsel %vm627_vm8, %v622_v50, %v624_v54  ;;  %v628_v60 = vsel %vm627_vm8, %v620_v55, %v622_v50 }
  0xb6   : > { %691 = vmatprep.subr.mxu1 %v629_v56 }
  0xb8   : > { %v590_v61 = vpop.permute.xlu0 %589  ;;  %v608_v62 = vpop.permute.xlu1 %607  ;;  %692 = vmatpush1.msra.mxu1 %v628_v60 }
  0xb9   : > { %v594_v0 = vsel %vm591_vm6, %v588_v42, %v590_v61  ;;  %v612_v1 = vsel %vm609_vm7, %v606_v44, %v608_v62  ;;  %2665 = vmatmul.mubr.msk.f32.vlgmr.msra.gmra.mrb[0].mxu1 %vm671_vm9, %v637_v59  ;;  %2872 = vmatprep.subr.bf16.mxu1 %v3224_v2 }
  0xba   : > { %600 = vst.msk [vmem:[#allocation2 + $0xa0] sm:$0xff] %vm502_vm0, %v594_v0  ;;  %618 = vst.msk [vmem:[#allocation2 + $0xb8] sm:$0xff] %vm502_vm0, %v612_v1  ;;  %2874 = vmatpush3.bf16.msra.mxu1 %v2873_v63  ;;  %2782 = vmatprep.mubr.msk.f32.mxu1 %vm3225_vm10, %v3221_v6 }
  0xbb   : > { %2875 = vmatprep.subr.bf16.mxu1 %v3224_v2 }
  0xbc   : > { %v626_v5 = vpop.permute.xlu0 %625 }
  0xbd   : > { %v630_v8 = vsel %vm627_vm8, %v624_v54, %v626_v5 }
  0xbe   : > { %636 = vst.msk [vmem:[#allocation2 + $0xd0] sm:$0xff] %vm502_vm0, %v630_v8  ;;  %2877 = vmatpush3.bf16.msra.mxu1 %v2876_v7  ;;  %vm1160_vm0 = vcmask 654848  }
  0xbf   : > { %2878 = vmatprep.subr.bf16.mxu1 %v3224_v2 }
  0xc1   : > { %v658_v12 = vld [vmem:[#allocation2 + $0xa0] sm:$0xff]  ;;  %v661_v13 = vld [vmem:[#allocation2 + $0xb8] sm:$0xff] }
  0xc2   : > { %2880 = vmatpush3.bf16.msra.mxu1 %v2879_v11  ;;  %v2882_v14 = vpack.c.bf16 %v661_v13, %v658_v12 }
  0xc3   : > { %2881 = vmatprep.subr.bf16.mxu1 %v3224_v2 }
  0xc5   : > { %v664_v15 = vld [vmem:[#allocation2 + $0xd0] sm:$0xff] }
  0xc6   : > { %2883 = vmatpush3.bf16.msra.mxu1 %v2882_v14 }
  0xc7   : > { %2780 = vmatprep.subr.mxu1 %v3221_v6 }
  0xc9   : > { %v669_v19 = vpop.permute.xlu1 %668 }
  0xca   : > { %2781 = vmatpush3.msra.mxu1 %v664_v15 }
  0xcb   : > { %2783 = vmatmul.mubr.msk.f32.vlgmr.msra.gmra.mrb[2].mxu1 %vm671_vm9, %v637_v59 }
  0xcc   : > { %1059 = vmatprep.mubr.f32.mxu1 %v3221_v6 }
 0x18c   : > { %v741_v22 = vpop.f32.mrb[0].mxu1 }
 0x18d   : > { %v742_v23 = vadd.f32 %v741_v22, %v669_v19  ;;  %v743_v25 = vpop.f32.mrb[1].mxu1 }
 0x18e   : > { %v744_v26 = vadd.f32 %v743_v25, %v669_v19 }
 0x18f   : > { %v816_v28 = vmax.f32 %v742_v23, 0.0 }
 0x190   : > { %v817_v29 = vmax.f32 %v744_v26, 0.0 }
 0x191   : > { %v3422_v30 = vmul.f32 %v824_v24, %v816_v28  ;;  %v958_v28 = vld [vmem:[%s4242_s5] sm:$0xff] }
 0x192   : > { %v3424_v31 = vmul.f32 %v828_v27, %v817_v29 }
 0x193   : > { %860 = vrot.lane.b32.xlu1 %v3422_v30, %s3215_s23  ;;  %846 = vrot.lane.b32.xlu0 %v3422_v30, %s3214_s22 }
 0x197   : > { %888 = vrot.lane.b32.xlu1 %v3422_v30, %s3217_s25  ;;  %874 = vrot.lane.b32.xlu0 %v3422_v30, %s3216_s24 }
 0x19b   : > { %862 = vrot.lane.b32.xlu1 %v3424_v31, %s3215_s23  ;;  %902 = vrot.lane.b32.xlu0 %v3422_v30, %s3218_s26 }
 0x19e   : > { %v812_v33 = vpop.f32.mrb[2].mxu1 }
 0x19f   : > { %v813_v34 = vadd.f32 %v812_v33, %v669_v19  ;;  %v2784_v36 = vpop.f32.mrb[3].mxu1  ;;  %876 = vrot.lane.b32.xlu1 %v3424_v31, %s3216_s24  ;;  %848 = vrot.lane.b32.xlu0 %v3424_v31, %s3214_s22 }
 0x1a1   : > { %v818_v37 = vmax.f32 %v813_v34, 0.0 }
 0x1a3   : > { %v838_v38 = vmul.f32 %v832_v35, %v818_v37  ;;  %890 = vrot.lane.b32.xlu1 %v3424_v31, %s3217_s25 }
 0x1a5   : > { %864 = vrot.lane.b32.xlu0 %v838_v38, %s3215_s23  ;;  %842 = vst.msk [vmem:[#allocation2 + $0x10] sm:$0xff] %vm841_vm11, %v838_v38  ;;  %s3226_s23 = smov 105  }
 0x1a7   : > { %904 = vrot.lane.b32.xlu1 %v3424_v31, %s3218_s26 }
 0x1a9   : > { %878 = vrot.lane.b32.xlu0 %v838_v38, %s3216_s24  ;;  %s3227_s24 = smov 101  }
 0x1ab   : > { %850 = vrot.lane.b32.xlu1 %v838_v38, %s3214_s22 }
 0x1ac   : > { %v961_v29 = vld [vmem:[#allocation2 + $0x10] sm:$0xff] }
 0x1ad   : > { %892 = vrot.lane.b32.xlu0 %v838_v38, %s3217_s25 }
 0x1af   : > { %918 = vrot.lane.b32.xlu1 %v3424_v31, %s3219_s27 }
 0x1b1   : > { %906 = vrot.lane.b32.xlu0 %v838_v38, %s3218_s26  ;;  %s3228_s26 = smov 107  }
 0x1b3   : > { %932 = vrot.lane.b32.xlu1 %v3424_v31, %s3220_s28 }
 0x1b5   : > { %920 = vrot.lane.b32.xlu0 %v838_v38, %s3219_s27 }
 0x1b7   : > { %916 = vrot.lane.b32.xlu1 %v3422_v30, %s3219_s27  ;;  %s3229_s27 = smov 97  }
 0x1b9   : > { %934 = vrot.lane.b32.xlu0 %v838_v38, %s3220_s28 }
 0x1bb   : > { %946 = vrot.lane.b32.xlu1 %v3424_v31, %s3222_s29 }
 0x1bd   : > { %930 = vrot.lane.b32.xlu0 %v3422_v30, %s3220_s28 }
 0x1bf   : > { %944 = vrot.lane.b32.xlu1 %v3422_v30, %s3222_s29 }
 0x1c1   : > { %948 = vrot.lane.b32.xlu0 %v838_v38, %s3222_s29  ;;  %s3230_s29 = smov 103  }
 0x1c5   : > { %989 = vperm.xlu0 %3011, %v986_v39  }
 0x205   : > { %v861_v40 = vpop.permute.xlu1 %860  ;;  %v847_v41 = vpop.permute.xlu0 %846 }
 0x209   : > { %v889_v42 = vpop.permute.xlu1 %888  ;;  %v875_v43 = vpop.permute.xlu0 %874 }
 0x20d   : > { %v863_v44 = vpop.permute.xlu1 %862  ;;  %v903_v45 = vpop.permute.xlu0 %902 }
 0x20e   : > { %v866_v46 = vsel %vm528_vm2, %v861_v40, %v863_v44 }
 0x211   : > { %v877_v47 = vpop.permute.xlu1 %876  ;;  %v849_v48 = vpop.permute.xlu0 %848 }
 0x212   : > { %v880_v49 = vsel %vm543_vm3, %v875_v43, %v877_v47  ;;  %v852_v50 = vsel %vm513_vm1, %v847_v41, %v849_v48 }
 0x213   : > { %v2886_v0 = vpack.c.bf16 %v852_v50, %v3422_v30  ;;  %v2890_v7 = vpack.c.bf16 %v880_v49, %v866_v46 }
 0x215   : > { %v891_v51 = vpop.permute.xlu1 %890 }
 0x216   : > { %v894_v52 = vsel %vm558_vm4, %v889_v42, %v891_v51 }
 0x217   : > { %v865_v53 = vpop.permute.xlu0 %864 }
 0x218   : > { %v867_v54 = vsel %vm528_vm2, %v863_v44, %v865_v53  ;;  %873 = vst.msk [vmem:[#allocation2 + $0x40] sm:$0xff] %vm841_vm11, %v865_v53  ;;  %vm1172_vm2 = vcmask 793600  }
 0x219   : > { %v905_v55 = vpop.permute.xlu1 %904 }
 0x21a   : > { %v908_v56 = vsel %vm573_vm5, %v903_v45, %v905_v55 }
 0x21b   : > { %v879_v57 = vpop.permute.xlu0 %878  ;;  %v2894_v12 = vpack.c.bf16 %v908_v56, %v894_v52 }
 0x21c   : > { %v881_v58 = vsel %vm543_vm3, %v877_v47, %v879_v57  ;;  %887 = vst.msk [vmem:[#allocation2 + $0x58] sm:$0xff] %vm841_vm11, %v879_v57  ;;  %vm1175_vm3 = vcmask 917248  }
 0x21d   : > { %v851_v59 = vpop.permute.xlu1 %850  ;;  %v2888_v3 = vpack.c.bf16 %v881_v58, %v867_v54 }
 0x21e   : > { %v853_v60 = vsel %vm513_vm1, %v849_v48, %v851_v59  ;;  %859 = vst.msk [vmem:[#allocation2 + $0x28] sm:$0xff] %vm841_vm11, %v851_v59  ;;  %vm1165_vm1 = vcmask 786048  }
 0x21f   : > { %v893_v61 = vpop.permute.xlu0 %892  ;;  %v2884_v62 = vpack.c.bf16 %v853_v60, %v3424_v31  ;;  %v967_v32 = vld [vmem:[#allocation2 + $0x40] sm:$0xff] }
 0x220   : > { %v895_v63 = vsel %vm558_vm4, %v891_v51, %v893_v61  ;;  %901 = vst.msk [vmem:[#allocation2 + $0x70] sm:$0xff] %vm841_vm11, %v893_v61  ;;  %vm1180_vm4 = vcmask 1048448  }
 0x221   : > { %v919_v1 = vpop.permute.xlu1 %918  ;;  %2885 = vmatprep.subr.bf16.mxu1 %v2884_v62 }
 0x222   : > { %2887 = vmatpush1.bf16.msra.mxu1 %v2886_v0 }
 0x223   : > { %v907_v4 = vpop.permute.xlu0 %906  ;;  %2889 = vmatprep.subr.bf16.mxu1 %v2888_v3  ;;  %v970_v31 = vld [vmem:[#allocation2 + $0x58] sm:$0xff] }
 0x224   : > { %v909_v5 = vsel %vm573_vm5, %v905_v55, %v907_v4  ;;  %915 = vst.msk [vmem:[#allocation2 + $0x88] sm:$0xff] %vm841_vm11, %v907_v4  ;;  %v2904_v33 = vpack.c.bf16 %v970_v31, %v967_v32  ;;  %vm1293_vm5 = vcmask 64512  }
 0x225   : > { %v933_v8 = vpop.permute.xlu1 %932  ;;  %v2892_v9 = vpack.c.bf16 %v909_v5, %v895_v63  ;;  %v964_v27 = vld [vmem:[#allocation2 + $0x28] sm:$0xff]  ;;  %v1221_v63 = vld [vmem:[%s4244_s7] sm:$0x1] }
 0x226   : > { %2891 = vmatpush1.bf16.msra.mxu1 %v2890_v7  ;;  %v2901_v30 = vpack.c.bf16 %v964_v27, %v961_v29  ;;  %2806 = vmatprep.subr.msk.mxu0 %vm1293_vm5, %v1221_v63 }
 0x227   : > { %v921_v10 = vpop.permute.xlu0 %920  ;;  %2893 = vmatprep.subr.bf16.mxu1 %v2892_v9  ;;  %v973_v35 = vld [vmem:[#allocation2 + $0x70] sm:$0xff]  ;;  %2807 = vmatpush3.xpose.msk.msra.mxu0 %vm1293_vm5, %v1221_v63  ;;  %v1618_v9 = vld [vmem:[%s4246_s9] sm:$0x1] }
 0x228   : > { %v923_v11 = vsel %vm591_vm6, %v919_v1, %v921_v10  ;;  %929 = vst.msk [vmem:[#allocation2 + $0xa0] sm:$0xff] %vm841_vm11, %v921_v10  ;;  %v1619_v10 = vld [vmem:[#allocation5] sm:$0x1] }
 0x229   : > { %v917_v13 = vpop.permute.xlu1 %916 }
 0x22a   : > { %v922_v14 = vsel %vm591_vm6, %v917_v13, %v919_v1  ;;  %2895 = vmatpush1.bf16.msra.mxu1 %v2894_v12  ;;  %vm1207_vm6 = vcmask 678912  }
 0x22b   : > { %v935_v15 = vpop.permute.xlu0 %934  ;;  %v976_v34 = vld [vmem:[#allocation2 + $0x88] sm:$0xff] }
 0x22c   : > { %v937_v16 = vsel %vm609_vm7, %v933_v8, %v935_v15  ;;  %943 = vst.msk [vmem:[#allocation2 + $0xb8] sm:$0xff] %vm841_vm11, %v935_v15  ;;  %v2907_v36 = vpack.c.bf16 %v976_v34, %v973_v35 }
 0x22d   : > { %v947_v17 = vpop.permute.xlu1 %946  ;;  %v2896_v19 = vpack.c.bf16 %v937_v16, %v923_v11 }
 0x22f   : > { %v931_v20 = vpop.permute.xlu0 %930  ;;  %2897 = vmatprep.subr.bf16.mxu1 %v2896_v19  ;;  %v979_v38 = vld [vmem:[#allocation2 + $0xa0] sm:$0xff] }
 0x230   : > { %v936_v21 = vsel %vm609_vm7, %v931_v20, %v933_v8 }
 0x231   : > { %v945_v22 = vpop.permute.xlu1 %944  ;;  %v2898_v23 = vpack.c.bf16 %v936_v21, %v922_v14 }
 0x232   : > { %v950_v24 = vsel %vm627_vm8, %v945_v22, %v947_v17 }
 0x233   : > { %v949_v25 = vpop.permute.xlu0 %948  ;;  %2899 = vmatpush1.bf16.msra.mxu1 %v2898_v23  ;;  %v982_v37 = vld [vmem:[#allocation2 + $0xb8] sm:$0xff] }
 0x234   : > { %v951_v26 = vsel %vm627_vm8, %v947_v17, %v949_v25  ;;  %957 = vst.msk [vmem:[#allocation2 + $0xd0] sm:$0xff] %vm841_vm11, %v949_v25  ;;  %v2910_v39 = vpack.c.bf16 %v982_v37, %v979_v38 }
 0x235   : > { %1011 = vmatprep.subr.mxu1 %v951_v26 }
 0x237   : > { %1012 = vmatpush1.msra.mxu1 %v950_v24 }
 0x238   : > { %2667 = vmatmul.mubr.msk.f32.vlgmr.msra.gmra.mrb[4].mxu1 %vm671_vm9, %v958_v28  ;;  %2900 = vmatprep.subr.bf16.mxu1 %v3224_v2 }
 0x239   : > { %2902 = vmatpush3.bf16.msra.mxu1 %v2901_v30  ;;  %2803 = vmatprep.mubr.msk.f32.mxu1 %vm3225_vm10, %v3221_v6 }
 0x23a   : > { %2903 = vmatprep.subr.bf16.mxu1 %v3224_v2 }
 0x23b   : > { %v985_v40 = vld [vmem:[#allocation2 + $0xd0] sm:$0xff] }
 0x23d   : > { %2905 = vmatpush3.bf16.msra.mxu1 %v2904_v33 }
 0x23e   : > { %2906 = vmatprep.subr.bf16.mxu1 %v3224_v2 }
 0x241   : > { %2908 = vmatpush3.bf16.msra.mxu1 %v2907_v36 }
 0x242   : > { %2909 = vmatprep.subr.bf16.mxu1 %v3224_v2 }
 0x244   : > { %v990_v41 = vpop.permute.xlu0 %989 }
 0x245   : > { %2911 = vmatpush3.bf16.msra.mxu1 %v2910_v39 }
 0x246   : > { %2801 = vmatprep.subr.mxu1 %v3221_v6 }
 0x249   : > { %2802 = vmatpush3.msra.mxu1 %v985_v40 }
 0x24a   : > { %2804 = vmatmul.mubr.msk.f32.vlgmr.msra.gmra.mrb[6].mxu1 %vm671_vm9, %v958_v28 }
 0x24b   : > { %1696 = vmatprep.mubr.f32.mxu1 %v3221_v6 }
 0x30b   : > { %v1061_v42 = vpop.f32.mrb[4].mxu1 }
 0x30c   : > { %v1062_v43 = vadd.f32 %v1061_v42, %v990_v41  ;;  %v1063_v44 = vpop.f32.mrb[5].mxu1 }
 0x30d   : > { %v1064_v2 = vadd.f32 %v1063_v44, %v990_v41 }
 0x30e   : > { %1147 = vrot.lane.b32.xlu0 %v1062_v43, %s3226_s23  ;;  %1137 = vrot.lane.b32.xlu1 %v1062_v43, %s3217_s25  ;;  %s3234_s25 = smov 93  }
 0x312   : > { %1157 = vrot.lane.b32.xlu0 %v1062_v43, %s3227_s24  ;;  %1142 = vrot.lane.b32.xlu1 %v1062_v43, %s3228_s26 }
 0x316   : > { %1168 = vrot.lane.b32.xlu0 %v1062_v43, %s3229_s27  ;;  %1152 = vrot.lane.b32.xlu1 %v1062_v43, %s3230_s29 }
 0x31a   : > { %1177 = vrot.lane.b32.xlu0 %v1064_v2, %s3231_s30  ;;  %1162 = vrot.lane.b32.xlu1 %v1062_v43, %s3232_s15  ;;  %s2709_s30 = sshll.u32 %s4310_s8, 4 }
 0x31b   : > { %s493_s8 = scalar_lea.vmem %s4249_s14, %s2709_s30 }
 0x31d   : > { %v1132_v45 = vpop.f32.mrb[6].mxu1 }
 0x31e   : > { %1186 = vrot.lane.b32.xlu0 %v1064_v2, %s3220_s28  ;;  %1170 = vrot.lane.b32.xlu1 %v1064_v2, %s3229_s27  ;;  %v2805_v46 = vpop.f32.mrb[7].mxu1  ;;  %v1133_v47 = vadd.f32 %v1132_v45, %v990_v41 }
 0x322   : > { %1194 = vrot.lane.b32.xlu0 %v1064_v2, %s3233_s16  ;;  %1182 = vrot.lane.b32.xlu1 %v1064_v2, %s3234_s25  ;;  %s488_s25 = scalar_lea.vmem %s4239_s2, %s2709_s30 }
 0x326   : > { %1203 = vrot.lane.b32.xlu0 %v1064_v2, %s3235_s17  ;;  %1190 = vrot.lane.b32.xlu1 %v1064_v2, %s3236_s18 }
 0x32a   : > { %1211 = vrot.lane.b32.xlu0 %v1133_v47, %s3237_s10  ;;  %1198 = vrot.lane.b32.xlu1 %v1064_v2, %s3238_s13  ;;  %v3573_v2 = vld [vmem:[#allocation4] ss:$0 sm:$0xff] }
 0x32e   : > { %1205 = vrot.lane.b32.xlu1 %v1133_v47, %s3235_s17 }
 0x332   : > { %1215 = vrot.lane.b32.xlu1 %v1133_v47, %s3239_s20 }
 0x380   : > { %v1148_v48 = vpop.permute.xlu0 %1147  ;;  %v1138_v49 = vpop.permute.xlu1 %1137 }
 0x381   : > { %1141 = vst.msk [vmem:[#allocation3] sm:$0xff] %vm1140_vm12, %v1138_v49 }
 0x384   : > { %v1158_v50 = vpop.permute.xlu0 %1157  ;;  %v1143_v51 = vpop.permute.xlu1 %1142 }
 0x385   : > { %1146 = vst.msk [vmem:[#allocation3] sm:$0xff] %vm1145_vm13, %v1143_v51 }
 0x386   : > { %1151 = vst.msk [vmem:[#allocation3] sm:$0xff] %vm1150_vm14, %v1148_v48 }
 0x388   : > { %v1169_v52 = vpop.permute.xlu0 %1168  ;;  %v1153_v53 = vpop.permute.xlu1 %1152 }
 0x389   : > { %1156 = vst.msk [vmem:[#allocation3] sm:$0xff] %vm1155_vm15, %v1153_v53 }
 0x38a   : > { %1161 = vst.msk [vmem:[#allocation3] sm:$0xff] %vm1160_vm0, %v1158_v50 }
 0x38c   : > { %v1178_v54 = vpop.permute.xlu0 %1177  ;;  %v1163_v55 = vpop.permute.xlu1 %1162 }
 0x38d   : > { %1166 = vst.msk [vmem:[#allocation3] sm:$0xff] %vm1165_vm1, %v1163_v55 }
 0x390   : > { %v1187_v56 = vpop.permute.xlu0 %1186  ;;  %v1171_v57 = vpop.permute.xlu1 %1170 }
 0x391   : > { %v1173_v58 = vsel %vm1172_vm2, %v1169_v52, %v1171_v57 }
 0x392   : > { %1176 = vst.msk [vmem:[#allocation3] sm:$0xff] %vm1175_vm3, %v1173_v58 }
 0x393   : > { %1181 = vst.msk [vmem:[#allocation3] sm:$0xff] %vm1180_vm4, %v1178_v54 }
 0x394   : > { %v1183_v59 = vpop.permute.xlu1 %1182  ;;  %v1195_v60 = vpop.permute.xlu0 %1194 }
 0x395   : > { %1185 = vst.msk [vmem:[#allocation3 + $0x8] sm:$0xff] %vm1140_vm12, %v1183_v59 }
 0x396   : > { %1189 = vst.msk [vmem:[#allocation3 + $0x8] sm:$0xff] %vm1145_vm13, %v1187_v56 }
 0x398   : > { %v1191_v61 = vpop.permute.xlu1 %1190  ;;  %v1204_v0 = vpop.permute.xlu0 %1203 }
 0x399   : > { %1193 = vst.msk [vmem:[#allocation3 + $0x8] sm:$0xff] %vm1150_vm14, %v1191_v61 }
 0x39a   : > { %1197 = vst.msk [vmem:[#allocation3 + $0x8] sm:$0xff] %vm1155_vm15, %v1195_v60  ;;  %v1219_v62 = vld [vmem:[#allocation3] sm:$0xff] }
 0x39b   : > { %1229 = vxpose.xlu0.b32.start.end [1/1] (short) %v1219_v62, 128 }
 0x39c   : > { %v1199_v1 = vpop.permute.xlu1 %1198  ;;  %v1212_v5 = vpop.permute.xlu0 %1211 }
 0x39d   : > { %1201 = vst.msk [vmem:[#allocation3 + $0x8] sm:$0xff] %vm1160_vm0, %v1199_v1 }
 0x3a0   : > { %v1206_v3 = vpop.permute.xlu1 %1205 }
 0x3a1   : > { %v1208_v4 = vsel %vm1207_vm6, %v1204_v0, %v1206_v3 }
 0x3a2   : > { %1210 = vst.msk [vmem:[#allocation3 + $0x8] sm:$0xff] %vm1165_vm1, %v1208_v4 }
 0x3a3   : > { %1214 = vst.msk [vmem:[#allocation3 + $0x8] sm:$0xff] %vm1175_vm3, %v1212_v5 }
 0x3a4   : > { %v1216_v7 = vpop.permute.xlu1 %1215 }
 0x3a5   : > { %1218 = vst.msk [vmem:[#allocation3 + $0x8] sm:$0xff] %vm1180_vm4, %v1216_v7 }
 0x3ac   : > { %v1220_v8 = vld [vmem:[#allocation3 + $0x8] sm:$0xff] }
 0x3ad   : > { %1261 = vxpose.xlu1.b32.start.end [1/1] (short) %v1220_v8, 128  ;;  %1632 = vmatprep.subr.mxu1 %v1220_v8 }
 0x3ae   : > { %1633 = vmatpush1.msra.mxu1 %v1219_v62 }
 0x3af   : > { %2703 = vmatmul.mubr.msk.f32.vlgmr.msra.gmra.mrb[8].mxu1 %vm1293_vm5, %v1618_v9  ;;  %1713 = vmatprep.subr.mxu1 %v1220_v8 }
 0x3b0   : > { %1714 = vmatpush1.msra.mxu1 %v1219_v62  ;;  %1777 = vmatprep.mubr.f32.mxu1 %v3221_v6 }
 0x400   : > { %1622 = vperm.xlu0 %3011, %v1619_v10  }
 0x41b   : > { %v1245_v11 = vpop.trf.xlu0 }
 0x41c   : > { %2808 = vmatprep.mubr.msk.f32.mxu0 %vm1293_vm5, %v1245_v11 }
 0x41f   : > { %v1246_v12 = vpop.trf.xlu0 }
 0x420   : > { %2809 = vmatmul.mubr.msk.f32.vlgmr.msra.gmra.mrb[0].mxu0 %vm1293_vm5, %v1246_v12 }
 0x423   : > { %v1247_v13 = vpop.trf.xlu0 }
 0x424   : > { %2811 = vmatprep.mubr.msk.f32.mxu0 %vm1293_vm5, %v1247_v13 }
 0x427   : > { %v1248_v14 = vpop.trf.xlu0 }
 0x428   : > { %2812 = vmatmul.mubr.msk.f32.gmra.mrb[2].mxu0 %vm1293_vm5, %v1248_v14 }
 0x42b   : > { %v1249_v15 = vpop.trf.xlu0 }
 0x42c   : > { %2814 = vmatprep.mubr.msk.f32.mxu0 %vm1293_vm5, %v1249_v15 }
 0x42d   : > { %v1277_v16 = vpop.trf.xlu1 }
 0x42f   : > { %v1250_v17 = vpop.trf.xlu0 }
 0x430   : > { %2815 = vmatmul.mubr.msk.f32.gmra.mrb[4].mxu0 %vm1293_vm5, %v1250_v17 }
 0x431   : > { %v1278_v6 = vpop.trf.xlu1 }
 0x433   : > { %v1251_v19 = vpop.trf.xlu0 }
 0x434   : > { %2817 = vmatprep.mubr.msk.f32.mxu0 %vm1293_vm5, %v1251_v19 }
 0x435   : > { %v1279_v20 = vpop.trf.xlu1 }
 0x437   : > { %v1252_v21 = vpop.trf.xlu0 }
 0x438   : > { %2818 = vmatmul.mubr.msk.f32.gmra.mrb[6].mxu0 %vm1293_vm5, %v1252_v21 }
 0x439   : > { %v1280_v22 = vpop.trf.xlu1 }
 0x43b   : > { %v1253_v23 = vpop.trf.xlu0 }
 0x43c   : > { %2820 = vmatprep.mubr.msk.f32.mxu0 %vm1293_vm5, %v1253_v23 }
 0x43d   : > { %v1281_v24 = vpop.trf.xlu1 }
 0x43f   : > { %v1254_v25 = vpop.trf.xlu0 }
 0x440   : > { %2821 = vmatmul.mubr.msk.f32.gmra.mrb[8].mxu0 %vm1293_vm5, %v1254_v25 }
 0x441   : > { %v1282_v26 = vpop.trf.xlu1 }
 0x443   : > { %v1255_v27 = vpop.trf.xlu0 }
 0x444   : > { %2823 = vmatprep.mubr.msk.f32.mxu0 %vm1293_vm5, %v1255_v27 }
 0x445   : > { %v1283_v28 = vpop.trf.xlu1 }
 0x447   : > { %v1256_v29 = vpop.trf.xlu0 }
 0x448   : > { %2824 = vmatmul.mubr.msk.f32.gmra.mrb[10].mxu0 %vm1293_vm5, %v1256_v29 }
 0x449   : > { %v1284_v30 = vpop.trf.xlu1 }
 0x44b   : > { %v1257_v31 = vpop.trf.xlu0 }
 0x44c   : > { %2826 = vmatprep.mubr.msk.f32.mxu0 %vm1293_vm5, %v1257_v31 }
 0x44d   : > { %v1285_v32 = vpop.trf.xlu1 }
 0x44f   : > { %v1258_v33 = vpop.trf.xlu0 }
 0x450   : > { %2827 = vmatmul.mubr.msk.f32.gmra.mrb[12].mxu0 %vm1293_vm5, %v1258_v33 }
 0x451   : > { %v1286_v35 = vpop.trf.xlu1 }
 0x453   : > { %v1259_v34 = vpop.trf.xlu0 }
 0x454   : > { %2829 = vmatprep.mubr.msk.f32.mxu0 %vm1293_vm5, %v1259_v34 }
 0x455   : > { %v1287_v37 = vpop.trf.xlu1 }
 0x457   : > { %v1260_v36 = vpop.trf.xlu0 }
 0x458   : > { %2830 = vmatmul.mubr.msk.f32.gmra.mrb[14].mxu0 %vm1293_vm5, %v1260_v36 }
 0x459   : > { %2832 = vmatprep.mubr.msk.f32.mxu0 %vm1293_vm5, %v1277_v16  ;;  %v1288_v38 = vpop.trf.xlu1 }
 0x45c   : > { %2833 = vmatmul.mubr.msk.f32.gmra.mrb[16].mxu0 %vm1293_vm5, %v1278_v6 }
 0x45d   : > { %2835 = vmatprep.mubr.msk.f32.mxu0 %vm1293_vm5, %v1279_v20  ;;  %v1289_v39 = vpop.trf.xlu1 }
 0x460   : > { %2836 = vmatmul.mubr.msk.f32.gmra.mrb[18].mxu0 %vm1293_vm5, %v1280_v22 }
 0x461   : > { %2838 = vmatprep.mubr.msk.f32.mxu0 %vm1293_vm5, %v1281_v24  ;;  %v1290_v40 = vpop.trf.xlu1 }
 0x464   : > { %2839 = vmatmul.mubr.msk.f32.gmra.mrb[20].mxu0 %vm1293_vm5, %v1282_v26 }
 0x465   : > { %2841 = vmatprep.mubr.msk.f32.mxu0 %vm1293_vm5, %v1283_v28  ;;  %v1291_v41 = vpop.trf.xlu1 }
 0x468   : > { %2842 = vmatmul.mubr.msk.f32.gmra.mrb[22].mxu0 %vm1293_vm5, %v1284_v30 }
 0x469   : > { %2844 = vmatprep.mubr.msk.f32.mxu0 %vm1293_vm5, %v1285_v32  ;;  %v1292_v42 = vpop.trf.xlu1 }
 0x46c   : > { %2845 = vmatmul.mubr.msk.f32.gmra.mrb[24].mxu0 %vm1293_vm5, %v1286_v35 }
 0x46d   : > { %2847 = vmatprep.mubr.msk.f32.mxu0 %vm1293_vm5, %v1287_v37 }
 0x470   : > { %2848 = vmatmul.mubr.msk.f32.gmra.mrb[26].mxu0 %vm1293_vm5, %v1288_v38 }
 0x471   : > { %2850 = vmatprep.mubr.msk.f32.mxu0 %vm1293_vm5, %v1289_v39 }
 0x474   : > { %2851 = vmatmul.mubr.msk.f32.gmra.mrb[28].mxu0 %vm1293_vm5, %v1290_v40 }
 0x475   : > { %2853 = vmatprep.mubr.msk.f32.mxu0 %vm1293_vm5, %v1291_v41 }
 0x478   : > { %2854 = vmatmul.mubr.msk.f32.gmra.mrb[30].mxu0 %vm1293_vm5, %v1292_v42 }
 0x482   : > { %v3569_v43 = vpop.f32.mrb[8].mxu1 }
 0x483   : > { %v3571_v44 = vpop.f32.mrb[9].mxu1 }
 0x4f3   : > { %v2810_v45 = vpop.f32.mrb[0].mxu0 }
 0x4f4   : > { %v1465_v46 = vadd.f32 %v2810_v45, %v3573_v2  ;;  %v1459_v47 = vpop.f32.mrb[1].mxu0 }
 0x4f5   : > { %v1460_v48 = vadd.f32 %v3573_v2, %v1459_v47  ;;  %v1623_v47 = vpop.permute.xlu0 %1622 }
 0x4f6   : > { %1791 = vperm.xlu0 %3011, %v1465_v46  }
 0x4f7   : > { %1786 = vperm.xlu1 %3010, %v1460_v48   ;;  %v1628_v48 = vrot.slane %v1623_v47, %v3416_v18 }
 0x4fb   : > { %v2813_v49 = vpop.f32.mrb[2].mxu0 }
 0x4fc   : > { %v1475_v50 = vadd.f32 %v2813_v49, %v3573_v2  ;;  %v1469_v51 = vpop.f32.mrb[3].mxu0  ;;  %v1699_v49 = vadd.f32 %v3569_v43, %v1628_v48 }
 0x4fd   : > { %v1470_v52 = vadd.f32 %v3573_v2, %v1469_v51 }
 0x4fe   : > { %1801 = vperm.xlu0 %3011, %v1475_v50   ;;  %v1701_v50 = vadd.f32 %v3571_v44, %v1628_v48  ;;  %v3613_v51 = vrot.slane %v1699_v49, %v3416_v18 }
 0x4ff   : > { %1796 = vperm.xlu1 %3010, %v1470_v52  }
 0x500   : > { %v3616_v52 = vrot.slane %v1701_v50, %v3416_v18 }
 0x503   : > { %v2816_v53 = vpop.f32.mrb[4].mxu0 }
 0x504   : > { %v1485_v54 = vadd.f32 %v2816_v53, %v3573_v2  ;;  %v1479_v55 = vpop.f32.mrb[5].mxu0 }
 0x505   : > { %v1480_v56 = vadd.f32 %v3573_v2, %v1479_v55 }
 0x506   : > { %1811 = vperm.xlu0 %3011, %v1485_v54  }
 0x507   : > { %1806 = vperm.xlu1 %3010, %v1480_v56  }
 0x50b   : > { %v2819_v57 = vpop.f32.mrb[6].mxu0 }
 0x50c   : > { %v1495_v58 = vadd.f32 %v2819_v57, %v3573_v2  ;;  %v1489_v59 = vpop.f32.mrb[7].mxu0 }
 0x50d   : > { %v1490_v60 = vadd.f32 %v3573_v2, %v1489_v59 }
 0x50e   : > { %1821 = vperm.xlu0 %3011, %v1495_v58  }
 0x50f   : > { %1816 = vperm.xlu1 %3010, %v1490_v60  }
 0x513   : > { %v2822_v61 = vpop.f32.mrb[8].mxu0 }
 0x514   : > { %v1505_v62 = vadd.f32 %v2822_v61, %v3573_v2  ;;  %v1499_v63 = vpop.f32.mrb[9].mxu0 }
 0x515   : > { %v1500_v0 = vadd.f32 %v3573_v2, %v1499_v63 }
 0x516   : > { %1831 = vperm.xlu0 %3011, %v1505_v62  }
 0x517   : > { %1826 = vperm.xlu1 %3010, %v1500_v0  }
 0x51b   : > { %v2825_v1 = vpop.f32.mrb[10].mxu0 }
 0x51c   : > { %v1515_v3 = vadd.f32 %v2825_v1, %v3573_v2  ;;  %v1509_v4 = vpop.f32.mrb[11].mxu0 }
 0x51d   : > { %v1510_v5 = vadd.f32 %v3573_v2, %v1509_v4 }
 0x51e   : > { %1841 = vperm.xlu0 %3011, %v1515_v3  }
 0x51f   : > { %1836 = vperm.xlu1 %3010, %v1510_v5  }
 0x523   : > { %v2828_v7 = vpop.f32.mrb[12].mxu0 }
 0x524   : > { %v1525_v8 = vadd.f32 %v2828_v7, %v3573_v2  ;;  %v1519_v9 = vpop.f32.mrb[13].mxu0 }
 0x525   : > { %v1520_v10 = vadd.f32 %v3573_v2, %v1519_v9 }
 0x526   : > { %1851 = vperm.xlu0 %3011, %v1525_v8  }
 0x527   : > { %1846 = vperm.xlu1 %3010, %v1520_v10  }
 0x52b   : > { %v2831_v11 = vpop.f32.mrb[14].mxu0 }
 0x52c   : > { %v1535_v12 = vadd.f32 %v2831_v11, %v3573_v2  ;;  %v1529_v13 = vpop.f32.mrb[15].mxu0 }
 0x52d   : > { %v1530_v14 = vadd.f32 %v3573_v2, %v1529_v13 }
 0x52e   : > { %1861 = vperm.xlu0 %3011, %v1535_v12  }
 0x52f   : > { %1856 = vperm.xlu1 %3010, %v1530_v14   ;;  %v2834_v15 = vpop.f32.mrb[16].mxu0 }
 0x530   : > { %v1545_v16 = vadd.f32 %v2834_v15, %v3573_v2  ;;  %v1539_v17 = vpop.f32.mrb[17].mxu0 }
 0x531   : > { %v1540_v6 = vadd.f32 %v3573_v2, %v1539_v17 }
 0x532   : > { %1871 = vperm.xlu0 %3011, %v1545_v16  }
 0x533   : > { %1866 = vperm.xlu1 %3010, %v1540_v6   ;;  %v2837_v19 = vpop.f32.mrb[18].mxu0 }
 0x534   : > { %v1555_v20 = vadd.f32 %v2837_v19, %v3573_v2  ;;  %v1549_v21 = vpop.f32.mrb[19].mxu0 }
 0x535   : > { %v1550_v22 = vadd.f32 %v3573_v2, %v1549_v21 }
 0x537   : > { %1881 = vperm.xlu1 %3010, %v1555_v20   ;;  %1876 = vperm.xlu0 %3011, %v1550_v22   ;;  %v2840_v23 = vpop.f32.mrb[20].mxu0 }
 0x538   : > { %v1565_v24 = vadd.f32 %v2840_v23, %v3573_v2  ;;  %v1559_v25 = vpop.f32.mrb[21].mxu0 }
 0x539   : > { %v1560_v26 = vadd.f32 %v3573_v2, %v1559_v25 }
 0x53b   : > { %1891 = vperm.xlu1 %3010, %v1565_v24   ;;  %1886 = vperm.xlu0 %3011, %v1560_v26   ;;  %v2843_v27 = vpop.f32.mrb[22].mxu0 }
 0x53c   : > { %v1575_v28 = vadd.f32 %v2843_v27, %v3573_v2  ;;  %v1569_v29 = vpop.f32.mrb[23].mxu0 }
 0x53d   : > { %v1570_v30 = vadd.f32 %v3573_v2, %v1569_v29 }
 0x53f   : > { %1901 = vperm.xlu1 %3010, %v1575_v28   ;;  %1896 = vperm.xlu0 %3011, %v1570_v30   ;;  %v2846_v31 = vpop.f32.mrb[24].mxu0 }
 0x540   : > { %v1585_v32 = vadd.f32 %v2846_v31, %v3573_v2  ;;  %v1579_v33 = vpop.f32.mrb[25].mxu0 }
 0x541   : > { %v1580_v34 = vadd.f32 %v3573_v2, %v1579_v33 }
 0x543   : > { %1911 = vperm.xlu1 %3010, %v1585_v32   ;;  %1906 = vperm.xlu0 %3011, %v1580_v34   ;;  %v2849_v35 = vpop.f32.mrb[26].mxu0 }
 0x544   : > { %v1595_v36 = vadd.f32 %v2849_v35, %v3573_v2  ;;  %v1589_v37 = vpop.f32.mrb[27].mxu0 }
 0x545   : > { %v1590_v38 = vadd.f32 %v3573_v2, %v1589_v37 }
 0x547   : > { %1921 = vperm.xlu1 %3010, %v1595_v36   ;;  %1916 = vperm.xlu0 %3011, %v1590_v38   ;;  %v2852_v39 = vpop.f32.mrb[28].mxu0 }
 0x548   : > { %v1605_v40 = vadd.f32 %v2852_v39, %v3573_v2  ;;  %v1599_v41 = vpop.f32.mrb[29].mxu0 }
 0x549   : > { %v1600_v42 = vadd.f32 %v3573_v2, %v1599_v41 }
 0x54b   : > { %1931 = vperm.xlu1 %3010, %v1605_v40   ;;  %1926 = vperm.xlu0 %3011, %v1600_v42   ;;  %v3605_v45 = vpop.f32.mrb[30].mxu0 }
 0x54c   : > { %v3607_v46 = vpop.f32.mrb[31].mxu0  ;;  %v1615_v48 = vadd.f32 %v3605_v45, %v3573_v2 }
 0x54d   : > { %v1610_v49 = vadd.f32 %v3573_v2, %v3607_v46 }
 0x575   : > { %v1792_v53 = vpop.permute.xlu0 %1791 }
 0x576   : > { %v3619_v54 = vmul.f32 %v3613_v51, %v1792_v53  ;;  %v3622_v55 = vmul.f32 %v3616_v52, %v1792_v53  ;;  %v1787_v56 = vpop.permute.xlu1 %1786 }
 0x577   : > { %v3625_v57 = vmul.f32 %v3613_v51, %v1787_v56  ;;  %v3628_v43 = vmul.f32 %v3616_v52, %v1787_v56 }
 0x578   : > { %v2019_v44 = vmax.f32 %v3619_v54, %v3622_v55 }
 0x579   : > { %v2016_v18 = vmax.f32 %v3625_v57, %v3628_v43 }
 0x57a   : > { %2020 = vmax.xlane.f32.xlu0 %v2019_v44 }
 0x57b   : > { %2017 = vmax.xlane.f32.xlu1 %v2016_v18 }
 0x57d   : > { %v1802_v58 = vpop.permute.xlu0 %1801 }
 0x57e   : > { %v3635_v59 = vmul.f32 %v3613_v51, %v1802_v58  ;;  %v3638_v60 = vmul.f32 %v3616_v52, %v1802_v58  ;;  %v1797_v61 = vpop.permute.xlu1 %1796 }
 0x57f   : > { %v3641_v62 = vmul.f32 %v3613_v51, %v1797_v61  ;;  %v3644_v63 = vmul.f32 %v3616_v52, %v1797_v61 }
 0x580   : > { %v2025_v0 = vmax.f32 %v3635_v59, %v3638_v60 }
 0x581   : > { %v2022_v1 = vmax.f32 %v3641_v62, %v3644_v63 }
 0x582   : > { %2026 = vmax.xlane.f32.xlu0 %v2025_v0 }
 0x583   : > { %2023 = vmax.xlane.f32.xlu1 %v2022_v1 }
 0x585   : > { %v1812_v3 = vpop.permute.xlu0 %1811 }
 0x586   : > { %v3651_v4 = vmul.f32 %v3613_v51, %v1812_v3  ;;  %v3654_v5 = vmul.f32 %v3616_v52, %v1812_v3  ;;  %v1807_v7 = vpop.permute.xlu1 %1806 }
 0x587   : > { %v3657_v8 = vmul.f32 %v3613_v51, %v1807_v7  ;;  %v3660_v9 = vmul.f32 %v3616_v52, %v1807_v7 }
 0x588   : > { %v2031_v10 = vmax.f32 %v3651_v4, %v3654_v5 }
 0x589   : > { %v2028_v11 = vmax.f32 %v3657_v8, %v3660_v9 }
 0x58a   : > { %2032 = vmax.xlane.f32.xlu0 %v2031_v10 }
 0x58b   : > { %2029 = vmax.xlane.f32.xlu1 %v2028_v11 }
 0x58d   : > { %v1822_v12 = vpop.permute.xlu0 %1821 }
 0x58e   : > { %v3667_v13 = vmul.f32 %v3613_v51, %v1822_v12  ;;  %v3670_v14 = vmul.f32 %v3616_v52, %v1822_v12  ;;  %v1817_v15 = vpop.permute.xlu1 %1816 }
 0x58f   : > { %v3673_v16 = vmul.f32 %v3613_v51, %v1817_v15  ;;  %v3676_v17 = vmul.f32 %v3616_v52, %v1817_v15 }
 0x590   : > { %v2037_v6 = vmax.f32 %v3667_v13, %v3670_v14 }
 0x591   : > { %v2034_v19 = vmax.f32 %v3673_v16, %v3676_v17 }
 0x592   : > { %2038 = vmax.xlane.f32.xlu0 %v2037_v6 }
 0x593   : > { %2035 = vmax.xlane.f32.xlu1 %v2034_v19 }
 0x595   : > { %v1832_v20 = vpop.permute.xlu0 %1831 }
 0x596   : > { %v3683_v21 = vmul.f32 %v3613_v51, %v1832_v20  ;;  %v3686_v22 = vmul.f32 %v3616_v52, %v1832_v20  ;;  %v1827_v23 = vpop.permute.xlu1 %1826 }
 0x597   : > { %v3689_v24 = vmul.f32 %v3613_v51, %v1827_v23  ;;  %v3692_v25 = vmul.f32 %v3616_v52, %v1827_v23 }
 0x598   : > { %v2043_v26 = vmax.f32 %v3683_v21, %v3686_v22 }
 0x599   : > { %v2040_v27 = vmax.f32 %v3689_v24, %v3692_v25 }
 0x59a   : > { %2044 = vmax.xlane.f32.xlu0 %v2043_v26 }
 0x59b   : > { %2041 = vmax.xlane.f32.xlu1 %v2040_v27 }
 0x59d   : > { %v1842_v28 = vpop.permute.xlu0 %1841 }
 0x59e   : > { %v3699_v29 = vmul.f32 %v3613_v51, %v1842_v28  ;;  %v3702_v30 = vmul.f32 %v3616_v52, %v1842_v28  ;;  %v1837_v31 = vpop.permute.xlu1 %1836 }
 0x59f   : > { %v3705_v32 = vmul.f32 %v3613_v51, %v1837_v31  ;;  %v3708_v33 = vmul.f32 %v3616_v52, %v1837_v31 }
 0x5a0   : > { %v2049_v34 = vmax.f32 %v3699_v29, %v3702_v30 }
 0x5a1   : > { %v2046_v35 = vmax.f32 %v3705_v32, %v3708_v33 }
 0x5a2   : > { %2050 = vmax.xlane.f32.xlu0 %v2049_v34 }
 0x5a3   : > { %2047 = vmax.xlane.f32.xlu1 %v2046_v35 }
 0x5a5   : > { %v1852_v36 = vpop.permute.xlu0 %1851 }
 0x5a6   : > { %v3715_v37 = vmul.f32 %v3613_v51, %v1852_v36  ;;  %v3718_v38 = vmul.f32 %v3616_v52, %v1852_v36  ;;  %v1847_v39 = vpop.permute.xlu1 %1846 }
 0x5a7   : > { %v3721_v40 = vmul.f32 %v3613_v51, %v1847_v39  ;;  %v3724_v41 = vmul.f32 %v3616_v52, %v1847_v39 }
 0x5a8   : > { %v2055_v42 = vmax.f32 %v3715_v37, %v3718_v38 }
 0x5a9   : > { %v2052_v47 = vmax.f32 %v3721_v40, %v3724_v41 }
 0x5aa   : > { %2056 = vmax.xlane.f32.xlu0 %v2055_v42 }
 0x5ab   : > { %2053 = vmax.xlane.f32.xlu1 %v2052_v47 }
 0x5ad   : > { %v1862_v50 = vpop.permute.xlu0 %1861 }
 0x5ae   : > { %v1857_v53 = vpop.permute.xlu1 %1856  ;;  %v3735_v18 = vmul.f32 %v3613_v51, %v1862_v50  ;;  %v3738_v58 = vmul.f32 %v3616_v52, %v1862_v50 }
 0x5af   : > { %v3741_v61 = vmul.f32 %v3613_v51, %v1857_v53  ;;  %v3744_v45 = vmul.f32 %v3616_v52, %v1857_v53 }
 0x5b0   : > { %v2061_v46 = vmax.f32 %v3735_v18, %v3738_v58 }
 0x5b1   : > { %v1872_v56 = vpop.permute.xlu0 %1871  ;;  %v2058_v7 = vmax.f32 %v3741_v61, %v3744_v45 }
 0x5b2   : > { %v1867_v44 = vpop.permute.xlu1 %1866  ;;  %v3757_v10 = vmul.f32 %v3613_v51, %v1872_v56  ;;  %v3760_v11 = vmul.f32 %v3616_v52, %v1872_v56 }
 0x5b3   : > { %v3749_v1 = vmul.f32 %v3613_v51, %v1867_v44  ;;  %v3752_v3 = vmul.f32 %v3616_v52, %v1867_v44 }
 0x5b4   : > { %v2067_v23 = vmax.f32 %v3757_v10, %v3760_v11 }
 0x5b5   : > { %v2064_v15 = vmax.f32 %v3749_v1, %v3752_v3 }
 0x5b6   : > { %v1877_v0 = vpop.permute.xlu0 %1876  ;;  %v1882_v2 = vpop.permute.xlu1 %1881 }
 0x5b7   : > { %v3765_v6 = vmul.f32 %v3613_v51, %v1877_v0  ;;  %v3768_v19 = vmul.f32 %v3616_v52, %v1877_v0  ;;  %v3773_v26 = vmul.f32 %v3613_v51, %v1882_v2  ;;  %v3776_v27 = vmul.f32 %v3616_v52, %v1882_v2 }
 0x5b9   : > { %v2070_v28 = vmax.f32 %v3765_v6, %v3768_v19  ;;  %v2073_v35 = vmax.f32 %v3773_v26, %v3776_v27 }
 0x5ba   : > { %v1887_v12 = vpop.permute.xlu0 %1886  ;;  %v1892_v20 = vpop.permute.xlu1 %1891 }
 0x5bb   : > { %v3781_v31 = vmul.f32 %v3613_v51, %v1887_v12  ;;  %v3784_v34 = vmul.f32 %v3616_v52, %v1887_v12  ;;  %v3789_v36 = vmul.f32 %v3613_v51, %v1892_v20  ;;  %v3792_v39 = vmul.f32 %v3616_v52, %v1892_v20 }
 0x5bc   : > { %1941 = vperm.xlu1 %3010, %v1615_v48  }
 0x5bd   : > { %4271 = vst [vmem:[#allocation7_spill] sm:$0xff] %v3792_v39  ;;  %v2076_v48 = vmax.f32 %v3781_v31, %v3784_v34  ;;  %v2079_v53 = vmax.f32 %v3789_v36, %v3792_v39 }
 0x5be   : > { %v1897_v42 = vpop.permute.xlu0 %1896  ;;  %v1902_v47 = vpop.permute.xlu1 %1901 }
 0x5bf   : > { %v3800_v50 = vmul.f32 %v3616_v52, %v1897_v42  ;;  %v3805_v56 = vmul.f32 %v3613_v51, %v1902_v47  ;;  %v3808_v44 = vmul.f32 %v3616_v52, %v1902_v47 }
 0x5c0   : > { %1936 = vperm.xlu0 %3011, %v1610_v49   ;;  %v3797_v49 = vmul.f32 %v3613_v51, %v1897_v42 }
 0x5c1   : > { %4273 = vst [vmem:[#allocation9_spill] sm:$0xff] %v3800_v50  ;;  %4274 = vst [vmem:[#allocation10_spill] sm:$0xff] %v3805_v56  ;;  %v2085_v2 = vmax.f32 %v3805_v56, %v3808_v44 }
 0x5c2   : > { %4272 = vst [vmem:[#allocation8_spill] sm:$0xff] %v3797_v49  ;;  %4275 = vst [vmem:[#allocation11_spill] sm:$0xff] %v3808_v44  ;;  %v2082_v0 = vmax.f32 %v3797_v49, %v3800_v50 }
 0x5df   : > { %2062 = vmax.xlane.f32.xlu0 %v2061_v46  ;;  %v1907_v46 = vpop.permute.xlu0 %1906 }
 0x5e0   : > { %2059 = vmax.xlane.f32.xlu1 %v2058_v7  ;;  %v1912_v7 = vpop.permute.xlu1 %1911 }
 0x5e3   : > { %2065 = vmax.xlane.f32.xlu0 %v2064_v15  ;;  %v3814_v12 = vpop.permute.xlu0 %1916 }
 0x5e4   : > { %2068 = vmax.xlane.f32.xlu1 %v2067_v23  ;;  %v3816_v15 = vpop.permute.xlu1 %1921 }
 0x5e7   : > { %2071 = vmax.xlane.f32.xlu0 %v2070_v28  ;;  %v3818_v20 = vpop.permute.xlu0 %1926 }
 0x5e8   : > { %2074 = vmax.xlane.f32.xlu1 %v2073_v35  ;;  %v3820_v23 = vpop.permute.xlu1 %1931 }
 0x5eb   : > { %2077 = vmax.xlane.f32.xlu0 %v2076_v48 }
 0x5ec   : > { %2080 = vmax.xlane.f32.xlu1 %v2079_v53 }
 0x5ef   : > { %2083 = vmax.xlane.f32.xlu0 %v2082_v0 }
 0x5f0   : > { %2086 = vmax.xlane.f32.xlu1 %v2085_v2 }
 0x607   : > { %v2021_v28 = vpop.xlane.xlu0 %2020 }
 0x608   : > { %v2114_v35 = vsub.f32 %v3619_v54, %v2021_v28  ;;  %v2115_v42 = vsub.f32 %v3622_v55, %v2021_v28  ;;  %v2018_v47 = vpop.xlane.xlu1 %2017 }
 0x609   : > { %v2112_v48 = vsub.f32 %v3625_v57, %v2018_v47  ;;  %v2113_v53 = vsub.f32 %v3628_v43, %v2018_v47  ;;  %v1703_v43 = vld [vmem:[%s4247_s11] sm:$0xff] }
 0x60a   : > { %v2180_v0 = vmul.f32 1.442695, %v2114_v35  ;;  %v2182_v2 = vmul.f32 1.442695, %v2115_v42  ;;  %2704 = vmatmul.mubr.msk.f32.vlgmr.msra.gmra.mrb[10].mxu1 %vm1293_vm5, %v1703_v43 }
 0x60b   : > { %v2176_v44 = vmul.f32 1.442695, %v2112_v48  ;;  %v2178_v56 = vmul.f32 1.442695, %v2113_v53 }
 0x60c   : > { %3012 = vpow2.f32 %v2180_v0  ;;  %v3853_v0 = vmul.f32 %v3613_v51, %v1907_v46 }
 0x60d   : > { %3014 = vpow2.f32 %v2182_v2 }
 0x60e   : > { %3016 = vpow2.f32 %v2176_v44 }
 0x60f   : > { %3018 = vpow2.f32 %v2178_v56  ;;  %v2027_v50 = vpop.xlane.xlu0 %2026 }
 0x610   : > { %v2118_v49 = vsub.f32 %v3635_v59, %v2027_v50  ;;  %v2119_v54 = vsub.f32 %v3638_v60, %v2027_v50  ;;  %v2024_v39 = vpop.xlane.xlu1 %2023 }
 0x611   : > { %v2116_v55 = vsub.f32 %v3641_v62, %v2024_v39  ;;  %v2117_v57 = vsub.f32 %v3644_v63, %v2024_v39  ;;  %v3839_v62 = vmul.f32 %v3613_v51, %v1912_v7 }
 0x612   : > { %v2188_v28 = vmul.f32 1.442695, %v2118_v49  ;;  %v2190_v35 = vmul.f32 1.442695, %v2119_v54  ;;  %v3844_v49 = vmul.f32 %v3616_v52, %v1912_v7  ;;  %v3858_v7 = vmul.f32 %v3616_v52, %v1907_v46 }
 0x613   : > { %v2184_v44 = vmul.f32 1.442695, %v2116_v55  ;;  %v2186_v56 = vmul.f32 1.442695, %v2117_v57 }
 0x614   : > { %3020 = vpow2.f32 %v2188_v28  ;;  %v2091_v28 = vmax.f32 %v3839_v62, %v3844_v49 }
 0x615   : > { %3022 = vpow2.f32 %v2190_v35  ;;  %v3872_v35 = vmul.f32 %v3613_v51, %v3816_v15 }
 0x616   : > { %v3834_v59 = vpop.eup %3012  ;;  %3024 = vpow2.f32 %v2184_v44 }
 0x617   : > { %v3836_v60 = vpop.eup %3014  ;;  %3026 = vpow2.f32 %v2186_v56  ;;  %v2033_v63 = vpop.xlane.xlu0 %2032 }
 0x618   : > { %v3841_v39 = vpop.eup %3016  ;;  %v2122_v50 = vsub.f32 %v3651_v4, %v2033_v63  ;;  %v2123_v42 = vsub.f32 %v3654_v5, %v2033_v63  ;;  %v2030_v47 = vpop.xlane.xlu1 %2029  ;;  %v2307_v48 = vadd.f32 %v3836_v60, %v3834_v59  ;;  %v3878_v63 = vmul.f32 %v3616_v52, %v3816_v15 }
 0x619   : > { %v3850_v53 = vpop.eup %3018  ;;  %v2120_v2 = vsub.f32 %v3657_v8, %v2030_v47  ;;  %v2121_v54 = vsub.f32 %v3660_v9, %v2030_v47  ;;  %v2088_v9 = vmax.f32 %v3853_v0, %v3858_v7 }
 0x61a   : > { %v2196_v55 = vmul.f32 1.442695, %v2122_v50  ;;  %v2198_v4 = vmul.f32 1.442695, %v2123_v42  ;;  %2308 = vadd.xlane.f32.xlu1 %v2307_v48  ;;  %v2304_v5 = vadd.f32 %v3850_v53, %v3841_v39 }
 0x61b   : > { %v2192_v57 = vmul.f32 1.442695, %v2120_v2  ;;  %v2194_v43 = vmul.f32 1.442695, %v2121_v54  ;;  %v3888_v54 = vmul.f32 %v3613_v51, %v3814_v12 }
 0x61c   : > { %3028 = vpow2.f32 %v2196_v55  ;;  %2305 = vadd.xlane.f32.xlu0 %v2304_v5 }
 0x61d   : > { %3030 = vpow2.f32 %v2198_v4  ;;  %v3894_v4 = vmul.f32 %v3616_v52, %v3814_v12 }
 0x61e   : > { %v3864_v8 = vpop.eup %3020  ;;  %3032 = vpow2.f32 %v2192_v57  ;;  %2092 = vmax.xlane.f32.xlu1 %v2091_v28  ;;  %v2097_v28 = vmax.f32 %v3872_v35, %v3878_v63 }
 0x61f   : > { %v3868_v46 = vpop.eup %3022  ;;  %3034 = vpow2.f32 %v2194_v43  ;;  %v2039_v44 = vpop.xlane.xlu0 %2038 }
 0x620   : > { %v3874_v56 = vpop.eup %3024  ;;  %2089 = vmax.xlane.f32.xlu0 %v2088_v9  ;;  %v2126_v50 = vsub.f32 %v3667_v13, %v2039_v44  ;;  %v2127_v42 = vsub.f32 %v3670_v14, %v2039_v44  ;;  %v2036_v47 = vpop.xlane.xlu1 %2035  ;;  %v2313_v48 = vadd.f32 %v3868_v46, %v3864_v8  ;;  %v3910_v44 = vmul.f32 %v3613_v51, %v3820_v23 }
 0x621   : > { %4276 = vst [vmem:[#allocation12_spill] sm:$0xff] %v3874_v56  ;;  %v3884_v2 = vpop.eup %3026  ;;  %v2124_v55 = vsub.f32 %v3673_v16, %v2036_v47  ;;  %v2125_v15 = vsub.f32 %v3676_v17, %v2036_v47  ;;  %v2094_v17 = vmax.f32 %v3888_v54, %v3894_v4 }
 0x622   : > { %v2204_v13 = vmul.f32 1.442695, %v2126_v50  ;;  %v2206_v14 = vmul.f32 1.442695, %v2127_v42  ;;  %2314 = vadd.xlane.f32.xlu1 %v2313_v48  ;;  %v2310_v5 = vadd.f32 %v3884_v2, %v3874_v56  ;;  %v3914_v50 = vmul.f32 %v3616_v52, %v3820_v23 }
 0x623   : > { %v2200_v57 = vmul.f32 1.442695, %v2124_v55  ;;  %v2202_v43 = vmul.f32 1.442695, %v2125_v15  ;;  %v3922_v48 = vmul.f32 %v3613_v51, %v3818_v20  ;;  %v3926_v55 = vmul.f32 %v3616_v52, %v3818_v20 }
 0x624   : > { %3036 = vpow2.f32 %v2204_v13  ;;  %2311 = vadd.xlane.f32.xlu0 %v2310_v5  ;;  %v2103_v13 = vmax.f32 %v3910_v44, %v3914_v50 }
 0x625   : > { %3038 = vpow2.f32 %v2206_v14 }
 0x626   : > { %v3900_v16 = vpop.eup %3028  ;;  %3040 = vpow2.f32 %v2200_v57  ;;  %2098 = vmax.xlane.f32.xlu1 %v2097_v28 }
 0x627   : > { %4277 = vst [vmem:[#allocation13_spill] sm:$0xff] %v3900_v16  ;;  %v3904_v12 = vpop.eup %3030  ;;  %3042 = vpow2.f32 %v2202_v43  ;;  %v2045_v15 = vpop.xlane.xlu0 %2044  ;;  %v2100_v43 = vmax.f32 %v3922_v48, %v3926_v55 }
 0x628   : > { %4278 = vst [vmem:[#allocation14_spill] sm:$0xff] %v3904_v12  ;;  %v3906_v9 = vpop.eup %3032  ;;  %2095 = vmax.xlane.f32.xlu0 %v2094_v17  ;;  %v2319_v42 = vadd.f32 %v3904_v12, %v3900_v16  ;;  %v2042_v14 = vpop.xlane.xlu1 %2041  ;;  %v2130_v5 = vsub.f32 %v3683_v21, %v2045_v15  ;;  %v2131_v20 = vsub.f32 %v3686_v22, %v2045_v15 }
 0x629   : > { %4279 = vst [vmem:[#allocation15_spill] sm:$0xff] %v3906_v9  ;;  %v3918_v47 = vpop.eup %3034  ;;  %v2128_v17 = vsub.f32 %v3689_v24, %v2042_v14 }
 0x62a   : > { %4280 = vst [vmem:[#allocation16_spill] sm:$0xff] %v3918_v47  ;;  %2320 = vadd.xlane.f32.xlu1 %v2319_v42  ;;  %v2316_v23 = vadd.f32 %v3918_v47, %v3906_v9  ;;  %v2129_v47 = vsub.f32 %v3692_v25, %v2042_v14  ;;  %v2212_v12 = vmul.f32 1.442695, %v2130_v5  ;;  %v2214_v15 = vmul.f32 1.442695, %v2131_v20 }
 0x62b   : > { %v2208_v56 = vmul.f32 1.442695, %v2128_v17 }
 0x62c   : > { %2317 = vadd.xlane.f32.xlu0 %v2316_v23  ;;  %v2210_v14 = vmul.f32 1.442695, %v2129_v47  ;;  %3044 = vpow2.f32 %v2212_v12 }
 0x62d   : > { %3046 = vpow2.f32 %v2214_v15 }
 0x62e   : > { %v3933_v57 = vpop.eup %3036  ;;  %2104 = vmax.xlane.f32.xlu1 %v2103_v13  ;;  %3048 = vpow2.f32 %v2208_v56 }
 0x62f   : > { %4281 = vst [vmem:[#allocation17_spill] sm:$0xff] %v3933_v57  ;;  %v3938_v28 = vpop.eup %3038  ;;  %v2051_v42 = vpop.xlane.xlu0 %2050  ;;  %3050 = vpow2.f32 %v2210_v14 }
 0x630   : > { %v3941_v9 = vpop.eup %3040  ;;  %2101 = vmax.xlane.f32.xlu0 %v2100_v43  ;;  %v2048_v23 = vpop.xlane.xlu1 %2047  ;;  %v2325_v21 = vadd.f32 %v3938_v28, %v3933_v57  ;;  %v2134_v22 = vsub.f32 %v3699_v29, %v2051_v42  ;;  %v2135_v13 = vsub.f32 %v3702_v30, %v2051_v42 }
 0x631   : > { %v3946_v16 = vpop.eup %3042  ;;  %v2132_v25 = vsub.f32 %v3705_v32, %v2048_v23  ;;  %v2133_v43 = vsub.f32 %v3708_v33, %v2048_v23 }
 0x632   : > { %2326 = vadd.xlane.f32.xlu1 %v2325_v21  ;;  %v2322_v24 = vadd.f32 %v3946_v16, %v3941_v9  ;;  %v2220_v57 = vmul.f32 1.442695, %v2134_v22  ;;  %v2222_v5 = vmul.f32 1.442695, %v2135_v13 }
 0x633   : > { %v2216_v29 = vmul.f32 1.442695, %v2132_v25  ;;  %v2218_v30 = vmul.f32 1.442695, %v2133_v43 }
 0x634   : > { %2323 = vadd.xlane.f32.xlu0 %v2322_v24  ;;  %3052 = vpow2.f32 %v2220_v57 }
 0x635   : > { %3054 = vpow2.f32 %v2222_v5 }
 0x636   : > { %3056 = vpow2.f32 %v2216_v29 }
 0x637   : > { %v2057_v20 = vpop.xlane.xlu0 %2056  ;;  %3058 = vpow2.f32 %v2218_v30 }
 0x638   : > { %v2138_v42 = vsub.f32 %v3715_v37, %v2057_v20  ;;  %v2139_v21 = vsub.f32 %v3718_v38, %v2057_v20  ;;  %v2054_v17 = vpop.xlane.xlu1 %2053  ;;  %v3964_v38 = vpop.eup %3044 }
 0x639   : > { %v2136_v32 = vsub.f32 %v3721_v40, %v2054_v17  ;;  %v2137_v33 = vsub.f32 %v3724_v41, %v2054_v17  ;;  %v3968_v57 = vpop.eup %3046 }
 0x63a   : > { %v2228_v12 = vmul.f32 1.442695, %v2138_v42  ;;  %v2230_v47 = vmul.f32 1.442695, %v2139_v21  ;;  %v3976_v25 = vpop.eup %3048  ;;  %v2331_v29 = vadd.f32 %v3968_v57, %v3964_v38 }
 0x63b   : > { %v2224_v56 = vmul.f32 1.442695, %v2136_v32  ;;  %v2226_v22 = vmul.f32 1.442695, %v2137_v33  ;;  %v3978_v14 = vpop.eup %3050 }
 0x63c   : > { %v1942_v23 = vpop.permute.xlu1 %1941  ;;  %3060 = vpow2.f32 %v2228_v12  ;;  %v2328_v30 = vadd.f32 %v3978_v14, %v3976_v25 }
 0x63d   : > { %v3959_v15 = vmul.f32 %v3613_v51, %v1942_v23  ;;  %v3962_v37 = vmul.f32 %v3616_v52, %v1942_v23  ;;  %3062 = vpow2.f32 %v2230_v47 }
 0x63e   : > { %3064 = vpow2.f32 %v2224_v56  ;;  %v3982_v5 = vpop.eup %3052 }
 0x63f   : > { %v2109_v40 = vmax.f32 %v3959_v15, %v3962_v37  ;;  %v1937_v41 = vpop.permute.xlu0 %1936  ;;  %3066 = vpow2.f32 %v2226_v22  ;;  %4282 = vst [vmem:[#allocation18_spill] sm:$0xff] %v3982_v5  ;;  %v3986_v20 = vpop.eup %3054 }
 0x640   : > { %v3971_v13 = vmul.f32 %v3613_v51, %v1937_v41  ;;  %v3974_v24 = vmul.f32 %v3616_v52, %v1937_v41  ;;  %v3988_v51 = vpop.eup %3056  ;;  %v2337_v21 = vadd.f32 %v3986_v20, %v3982_v5 }
 0x641   : > { %2110 = vmax.xlane.f32.xlu1 %v2109_v40  ;;  %v3990_v52 = vpop.eup %3058 }
 0x642   : > { %v2106_v43 = vmax.f32 %v3971_v13, %v3974_v24  ;;  %v2334_v33 = vadd.f32 %v3990_v52, %v3988_v51 }
 0x644   : > { %2107 = vmax.xlane.f32.xlu0 %v2106_v43 }
 0x645   : > { %2332 = vadd.xlane.f32.xlu1 %v2331_v29 }
 0x646   : > { %v3994_v42 = vpop.eup %3060 }
 0x647   : > { %4283 = vst [vmem:[#allocation19_spill] sm:$0xff] %v3994_v42  ;;  %v3998_v17 = vpop.eup %3062 }
 0x648   : > { %2329 = vadd.xlane.f32.xlu0 %v2328_v30  ;;  %v4000_v32 = vpop.eup %3064  ;;  %v2343_v47 = vadd.f32 %v3998_v17, %v3994_v42 }
 0x649   : > { %2338 = vadd.xlane.f32.xlu1 %v2337_v21  ;;  %4284 = vst [vmem:[#allocation20_spill] sm:$0xff] %v4000_v32  ;;  %v4004_v12 = vpop.eup %3066 }
 0x64a   : > { %v2340_v56 = vadd.f32 %v4004_v12, %v4000_v32 }
 0x64c   : > { %2335 = vadd.xlane.f32.xlu0 %v2334_v33 }
 0x64d   : > { %2344 = vadd.xlane.f32.xlu1 %v2343_v47 }
 0x650   : > { %2341 = vadd.xlane.f32.xlu0 %v2340_v56 }
 0x66c   : > { %v2063_v23 = vpop.xlane.xlu0 %2062 }
 0x66d   : > { %v2142_v22 = vsub.f32 %v3735_v18, %v2063_v23  ;;  %v2143_v40 = vsub.f32 %v3738_v58, %v2063_v23  ;;  %v2060_v41 = vpop.xlane.xlu1 %2059 }
 0x66e   : > { %v2140_v43 = vsub.f32 %v3741_v61, %v2060_v41  ;;  %v2141_v29 = vsub.f32 %v3744_v45, %v2060_v41 }
 0x66f   : > { %v2236_v30 = vmul.f32 1.442695, %v2142_v22  ;;  %v2238_v21 = vmul.f32 1.442695, %v2143_v40 }
 0x670   : > { %v2232_v5 = vmul.f32 1.442695, %v2140_v43  ;;  %v2234_v42 = vmul.f32 1.442695, %v2141_v29  ;;  %v2066_v33 = vpop.xlane.xlu0 %2065 }
 0x671   : > { %3068 = vpow2.f32 %v2236_v30  ;;  %v2144_v47 = vsub.f32 %v3749_v1, %v2066_v33  ;;  %v2145_v56 = vsub.f32 %v3752_v3, %v2066_v33  ;;  %v2069_v32 = vpop.xlane.xlu1 %2068  ;;  %v4285_v33 = vld [vmem:[#allocation7_spill] sm:$0xff] }
 0x672   : > { %3070 = vpow2.f32 %v2238_v21  ;;  %v2146_v18 = vsub.f32 %v3757_v10, %v2069_v32  ;;  %v2147_v58 = vsub.f32 %v3760_v11, %v2069_v32 }
 0x673   : > { %3072 = vpow2.f32 %v2232_v5  ;;  %v2240_v61 = vmul.f32 1.442695, %v2144_v47  ;;  %v2242_v23 = vmul.f32 1.442695, %v2145_v56 }
 0x674   : > { %3074 = vpow2.f32 %v2234_v42  ;;  %v2244_v45 = vmul.f32 1.442695, %v2146_v18  ;;  %v2246_v22 = vmul.f32 1.442695, %v2147_v58  ;;  %v2072_v40 = vpop.xlane.xlu0 %2071 }
 0x675   : > { %3076 = vpow2.f32 %v2240_v61  ;;  %v2148_v41 = vsub.f32 %v3765_v6, %v2072_v40  ;;  %v2149_v1 = vsub.f32 %v3768_v19, %v2072_v40  ;;  %v2075_v43 = vpop.xlane.xlu1 %2074 }
 0x676   : > { %3078 = vpow2.f32 %v2242_v23  ;;  %v2150_v3 = vsub.f32 %v3773_v26, %v2075_v43  ;;  %v2151_v10 = vsub.f32 %v3776_v27, %v2075_v43  ;;  %v4288_v43 = vld [vmem:[#allocation10_spill] sm:$0xff] }
 0x677   : > { %3080 = vpow2.f32 %v2244_v45  ;;  %v2248_v11 = vmul.f32 1.442695, %v2148_v41  ;;  %v2250_v5 = vmul.f32 1.442695, %v2149_v1 }
 0x678   : > { %3082 = vpow2.f32 %v2246_v22  ;;  %v2252_v32 = vmul.f32 1.442695, %v2150_v3  ;;  %v2254_v42 = vmul.f32 1.442695, %v2151_v10  ;;  %v2078_v29 = vpop.xlane.xlu0 %2077  ;;  %v4287_v22 = vld [vmem:[#allocation9_spill] sm:$0xff]  ;;  %v4289_v10 = vld [vmem:[#allocation11_spill] sm:$0xff] }
 0x679   : > { %3084 = vpow2.f32 %v2248_v11  ;;  %v2152_v30 = vsub.f32 %v3781_v31, %v2078_v29  ;;  %v2153_v6 = vsub.f32 %v3784_v34, %v2078_v29  ;;  %v2081_v21 = vpop.xlane.xlu1 %2080  ;;  %v4286_v34 = vld [vmem:[#allocation8_spill] sm:$0xff] }
 0x67a   : > { %3086 = vpow2.f32 %v2250_v5  ;;  %v2154_v19 = vsub.f32 %v3789_v36, %v2081_v21  ;;  %v2155_v26 = vsub.f32 %v4285_v33, %v2081_v21 }
 0x67b   : > { %v4026_v47 = vpop.eup %3068  ;;  %3088 = vpow2.f32 %v2252_v32  ;;  %v2256_v27 = vmul.f32 1.442695, %v2152_v30  ;;  %v2258_v56 = vmul.f32 1.442695, %v2153_v6 }
 0x67c   : > { %v4028_v18 = vpop.eup %3070  ;;  %3090 = vpow2.f32 %v2254_v42  ;;  %v2260_v58 = vmul.f32 1.442695, %v2154_v19  ;;  %v2262_v61 = vmul.f32 1.442695, %v2155_v26  ;;  %v2084_v23 = vpop.xlane.xlu0 %2083 }
 0x67d   : > { %v4030_v31 = vpop.eup %3072  ;;  %3092 = vpow2.f32 %v2256_v27  ;;  %v2156_v45 = vsub.f32 %v4286_v34, %v2084_v23  ;;  %v2157_v36 = vsub.f32 %v4287_v22, %v2084_v23  ;;  %v2087_v40 = vpop.xlane.xlu1 %2086  ;;  %v2349_v41 = vadd.f32 %v4028_v18, %v4026_v47 }
 0x67e   : > { %v4036_v1 = vpop.eup %3074  ;;  %3094 = vpow2.f32 %v2258_v56  ;;  %v2158_v3 = vsub.f32 %v4288_v43, %v2087_v40  ;;  %v2159_v11 = vsub.f32 %v4289_v10, %v2087_v40 }
 0x67f   : > { %v4040_v5 = vpop.eup %3076  ;;  %3096 = vpow2.f32 %v2260_v58  ;;  %v2264_v32 = vmul.f32 1.442695, %v2156_v45  ;;  %v2266_v42 = vmul.f32 1.442695, %v2157_v36  ;;  %2350 = vadd.xlane.f32.xlu1 %v2349_v41  ;;  %v2346_v29 = vadd.f32 %v4036_v1, %v4030_v31 }
 0x680   : > { %v4044_v30 = vpop.eup %3078  ;;  %3098 = vpow2.f32 %v2262_v61  ;;  %v2268_v6 = vmul.f32 1.442695, %v2158_v3  ;;  %v2270_v21 = vmul.f32 1.442695, %v2159_v11 }
 0x681   : > { %v4046_v19 = vpop.eup %3080  ;;  %3100 = vpow2.f32 %v2264_v32  ;;  %2347 = vadd.xlane.f32.xlu0 %v2346_v29  ;;  %v2352_v33 = vadd.f32 %v4044_v30, %v4040_v5 }
 0x682   : > { %v4050_v26 = vpop.eup %3082  ;;  %3102 = vpow2.f32 %v2266_v42 }
 0x683   : > { %v4052_v27 = vpop.eup %3084  ;;  %3104 = vpow2.f32 %v2268_v6  ;;  %v2355_v56 = vadd.f32 %v4050_v26, %v4046_v19 }
 0x684   : > { %v4056_v58 = vpop.eup %3086  ;;  %3106 = vpow2.f32 %v2270_v21 }
 0x685   : > { %v4058_v61 = vpop.eup %3088  ;;  %2353 = vadd.xlane.f32.xlu0 %v2352_v33  ;;  %2356 = vadd.xlane.f32.xlu1 %v2355_v56  ;;  %v2358_v23 = vadd.f32 %v4056_v58, %v4052_v27 }
 0x686   : > { %v4062_v34 = vpop.eup %3090 }
 0x687   : > { %v4064_v45 = vpop.eup %3092  ;;  %v2361_v22 = vadd.f32 %v4062_v34, %v4058_v61 }
 0x688   : > { %4290 = vst [vmem:[#allocation7_spill] sm:$0xff] %v4064_v45  ;;  %v4068_v36 = vpop.eup %3094 }
 0x689   : > { %v4070_v40 = vpop.eup %3096  ;;  %2359 = vadd.xlane.f32.xlu0 %v2358_v23  ;;  %2362 = vadd.xlane.f32.xlu1 %v2361_v22  ;;  %v2364_v41 = vadd.f32 %v4068_v36, %v4064_v45 }
 0x68a   : > { %4291 = vst [vmem:[#allocation8_spill] sm:$0xff] %v4070_v40  ;;  %v4074_v43 = vpop.eup %3098 }
 0x68b   : > { %v4076_v3 = vpop.eup %3100  ;;  %v2367_v10 = vadd.f32 %v4074_v43, %v4070_v40 }
 0x68c   : > { %4292 = vst [vmem:[#allocation9_spill] sm:$0xff] %v4076_v3  ;;  %v4080_v11 = vpop.eup %3102 }
 0x68d   : > { %4293 = vst [vmem:[#allocation10_spill] sm:$0xff] %v4080_v11  ;;  %v4082_v32 = vpop.eup %3104  ;;  %2365 = vadd.xlane.f32.xlu0 %v2364_v41  ;;  %2368 = vadd.xlane.f32.xlu1 %v2367_v10  ;;  %v2370_v42 = vadd.f32 %v4080_v11, %v4076_v3 }
 0x68e   : > { %4294 = vst [vmem:[#allocation11_spill] sm:$0xff] %v4082_v32  ;;  %v4086_v29 = vpop.eup %3106 }
 0x68f   : > { %v2373_v6 = vadd.f32 %v4086_v29, %v4082_v32 }
 0x691   : > { %2371 = vadd.xlane.f32.xlu0 %v2370_v42  ;;  %2374 = vadd.xlane.f32.xlu1 %v2373_v6 }
 0x6a7   : > { %v2309_v21 = vpop.xlane.xlu1 %2308 }
 0x6a8   : > { %3108 = vrcp.f32 %v2309_v21 }
 0x6a9   : > { %v2306_v33 = vpop.xlane.xlu0 %2305 }
 0x6aa   : > { %3110 = vrcp.f32 %v2306_v33 }
 0x6ab   : > { %v2093_v56 = vpop.xlane.xlu1 %2092 }
 0x6ac   : > { %v2162_v23 = vsub.f32 %v3839_v62, %v2093_v56  ;;  %v2163_v22 = vsub.f32 %v3844_v49, %v2093_v56 }
 0x6ad   : > { %v2090_v41 = vpop.xlane.xlu0 %2089 }
 0x6ae   : > { %v2276_v10 = vmul.f32 1.442695, %v2162_v23  ;;  %v2278_v40 = vmul.f32 1.442695, %v2163_v22  ;;  %v2160_v3 = vsub.f32 %v3853_v0, %v2090_v41  ;;  %v2161_v11 = vsub.f32 %v3858_v7, %v2090_v41 }
 0x6af   : > { %v2315_v45 = vpop.xlane.xlu1 %2314 }
 0x6b0   : > { %3112 = vpow2.f32 %v2276_v10  ;;  %v2272_v42 = vmul.f32 1.442695, %v2160_v3  ;;  %v2274_v6 = vmul.f32 1.442695, %v2161_v11 }
 0x6b1   : > { %3114 = vpow2.f32 %v2278_v40  ;;  %v2312_v21 = vpop.xlane.xlu0 %2311 }
 0x6b2   : > { %v3109_v32 = vpop.eup %3108  ;;  %3116 = vpow2.f32 %v2272_v42 }
 0x6b3   : > { %3118 = vpow2.f32 %v2274_v6  ;;  %v2099_v33 = vpop.xlane.xlu1 %2098  ;;  %v2435_v62 = vmul.f32 %v3109_v32, %v3836_v60  ;;  %v2434_v49 = vmul.f32 %v3109_v32, %v3834_v59 }
 0x6b4   : > { %v3111_v56 = vpop.eup %3110  ;;  %3120 = vrcp.f32 %v2315_v45  ;;  %v2166_v0 = vsub.f32 %v3872_v35, %v2099_v33  ;;  %v2167_v7 = vsub.f32 %v3878_v63, %v2099_v33 }
 0x6b5   : > { %3122 = vrcp.f32 %v2312_v21  ;;  %v2096_v23 = vpop.xlane.xlu0 %2095  ;;  %v2433_v3 = vmul.f32 %v3111_v56, %v3850_v53  ;;  %v2432_v40 = vmul.f32 %v3111_v56, %v3841_v39 }
 0x6b6   : > { %v2284_v11 = vmul.f32 1.442695, %v2166_v0  ;;  %v2286_v22 = vmul.f32 1.442695, %v2167_v7  ;;  %v2164_v41 = vsub.f32 %v3888_v54, %v2096_v23  ;;  %v2165_v60 = vsub.f32 %v3894_v4, %v2096_v23 }
 0x6b7   : > { %v2321_v10 = vpop.xlane.xlu1 %2320  ;;  %v2912_v59 = vpack.c.bf16 %v2435_v62, %v2433_v3  ;;  %v2914_v32 = vpack.c.bf16 %v2434_v49, %v2432_v40 }
 0x6b8   : > { %3124 = vpow2.f32 %v2284_v11  ;;  %v2280_v45 = vmul.f32 1.442695, %v2164_v41  ;;  %v2282_v35 = vmul.f32 1.442695, %v2165_v60 }
 0x6b9   : > { %3126 = vpow2.f32 %v2286_v22  ;;  %v2318_v63 = vpop.xlane.xlu0 %2317  ;;  %2913 = vmatprep.subr.bf16.mxu0 %v2912_v59 }
 0x6ba   : > { %v4102_v42 = vpop.eup %3112  ;;  %3128 = vpow2.f32 %v2280_v45  ;;  %2915 = vmatpush1.bf16.xpose.msra.mxu0 %v2914_v32 }
 0x6bb   : > { %v4104_v39 = vpop.eup %3114  ;;  %3130 = vpow2.f32 %v2282_v35  ;;  %v2105_v53 = vpop.xlane.xlu1 %2104 }
 0x6bc   : > { %v4106_v54 = vpop.eup %3116  ;;  %3132 = vrcp.f32 %v2321_v10  ;;  %v2170_v4 = vsub.f32 %v3910_v44, %v2105_v53  ;;  %v2171_v6 = vsub.f32 %v3914_v50, %v2105_v53  ;;  %v2379_v21 = vadd.f32 %v4104_v39, %v4102_v42 }
 0x6bd   : > { %v4112_v33 = vpop.eup %3118  ;;  %3134 = vrcp.f32 %v2318_v63  ;;  %v2102_v62 = vpop.xlane.xlu0 %2101 }
 0x6be   : > { %v3121_v49 = vpop.eup %3120  ;;  %v2292_v56 = vmul.f32 1.442695, %v2170_v4  ;;  %v2294_v0 = vmul.f32 1.442695, %v2171_v6  ;;  %v2168_v7 = vsub.f32 %v3922_v48, %v2102_v62  ;;  %v2169_v23 = vsub.f32 %v3926_v55, %v2102_v62  ;;  %2380 = vadd.xlane.f32.xlu1 %v2379_v21  ;;  %v4295_v48 = vld [vmem:[#allocation12_spill] sm:$0xff]  ;;  %v4296_v6 = vld [vmem:[#allocation14_spill] sm:$0xff] }
 0x6bf   : > { %v3123_v3 = vpop.eup %3122  ;;  %v2376_v44 = vadd.f32 %v4112_v33, %v4106_v54  ;;  %v2439_v50 = vmul.f32 %v3121_v49, %v3868_v46  ;;  %v2438_v40 = vmul.f32 %v3121_v49, %v3864_v8  ;;  %v2327_v60 = vpop.xlane.xlu1 %2326  ;;  %v4297_v62 = vld [vmem:[#allocation13_spill] sm:$0xff] }
 0x6c0   : > { %3136 = vpow2.f32 %v2292_v56  ;;  %v2288_v11 = vmul.f32 1.442695, %v2168_v7  ;;  %v2290_v22 = vmul.f32 1.442695, %v2169_v23  ;;  %v2437_v41 = vmul.f32 %v3123_v3, %v3884_v2  ;;  %v4298_v56 = vld [vmem:[#allocation16_spill] sm:$0xff]  ;;  %v4299_v7 = vld [vmem:[#allocation15_spill] sm:$0xff] }
 0x6c1   : > { %3138 = vpow2.f32 %v2294_v0  ;;  %2377 = vadd.xlane.f32.xlu0 %v2376_v44  ;;  %v2436_v10 = vmul.f32 %v3123_v3, %v4295_v48  ;;  %v2324_v59 = vpop.xlane.xlu0 %2323 }
 0x6c2   : > { %v4122_v55 = vpop.eup %3124  ;;  %3140 = vpow2.f32 %v2288_v11  ;;  %v2916_v32 = vpack.c.bf16 %v2439_v50, %v2437_v41 }
 0x6c3   : > { %v4124_v45 = vpop.eup %3126  ;;  %3142 = vpow2.f32 %v2290_v22  ;;  %v2918_v46 = vpack.c.bf16 %v2438_v40, %v2436_v10 }
 0x6c4   : > { %v4126_v8 = vpop.eup %3128  ;;  %3144 = vrcp.f32 %v2327_v60  ;;  %2917 = vmatprep.subr.bf16.mxu0 %v2916_v32  ;;  %v2385_v2 = vadd.f32 %v4124_v45, %v4122_v55 }
 0x6c5   : > { %v4130_v35 = vpop.eup %3130  ;;  %3146 = vrcp.f32 %v2324_v59  ;;  %2919 = vmatpush1.bf16.xpose.msra.mxu0 %v2918_v46 }
 0x6c6   : > { %v3133_v63 = vpop.eup %3132  ;;  %2386 = vadd.xlane.f32.xlu1 %v2385_v2  ;;  %v2382_v53 = vadd.f32 %v4130_v35, %v4126_v8 }
 0x6c7   : > { %v3135_v4 = vpop.eup %3134  ;;  %v2443_v21 = vmul.f32 %v3133_v63, %v4296_v6  ;;  %v2442_v49 = vmul.f32 %v3133_v63, %v4297_v62  ;;  %v4300_v63 = vld [vmem:[#allocation17_spill] sm:$0xff] }
 0x6c8   : > { %2383 = vadd.xlane.f32.xlu0 %v2382_v53  ;;  %v2441_v0 = vmul.f32 %v3135_v4, %v4298_v56  ;;  %v2440_v23 = vmul.f32 %v3135_v4, %v4299_v7 }
 0x6ca   : > { %v4138_v3 = vpop.eup %3136  ;;  %v2920_v44 = vpack.c.bf16 %v2443_v21, %v2441_v0  ;;  %v2922_v50 = vpack.c.bf16 %v2442_v49, %v2440_v23 }
 0x6cb   : > { %v4140_v40 = vpop.eup %3138 }
 0x6cc   : > { %v4142_v11 = vpop.eup %3140  ;;  %2921 = vmatprep.subr.bf16.mxu0 %v2920_v44  ;;  %v2391_v22 = vadd.f32 %v4140_v40, %v4138_v3 }
 0x6cd   : > { %v4146_v41 = vpop.eup %3142  ;;  %2923 = vmatpush1.bf16.xpose.msra.mxu0 %v2922_v50 }
 0x6ce   : > { %v3145_v60 = vpop.eup %3144  ;;  %2392 = vadd.xlane.f32.xlu1 %v2391_v22  ;;  %v2388_v48 = vadd.f32 %v4146_v41, %v4142_v11  ;;  %v2111_v10 = vpop.xlane.xlu1 %2110 }
 0x6cf   : > { %v3147_v59 = vpop.eup %3146  ;;  %v2174_v32 = vsub.f32 %v3959_v15, %v2111_v10  ;;  %v2175_v46 = vsub.f32 %v3962_v37, %v2111_v10  ;;  %v2447_v2 = vmul.f32 %v3145_v60, %v3938_v28  ;;  %v2446_v53 = vmul.f32 %v3145_v60, %v4300_v63 }
 0x6d0   : > { %2389 = vadd.xlane.f32.xlu0 %v2388_v48  ;;  %v2445_v4 = vmul.f32 %v3147_v59, %v3946_v16  ;;  %v2444_v6 = vmul.f32 %v3147_v59, %v3941_v9 }
 0x6d1   : > { %v2300_v21 = vmul.f32 1.442695, %v2174_v32  ;;  %v2302_v62 = vmul.f32 1.442695, %v2175_v46  ;;  %v2108_v49 = vpop.xlane.xlu0 %2107 }
 0x6d2   : > { %v2924_v56 = vpack.c.bf16 %v2447_v2, %v2445_v4  ;;  %v2926_v0 = vpack.c.bf16 %v2446_v53, %v2444_v6  ;;  %v2172_v7 = vsub.f32 %v3971_v13, %v2108_v49  ;;  %v2173_v15 = vsub.f32 %v3974_v24, %v2108_v49  ;;  %v2333_v23 = vpop.xlane.xlu1 %2332 }
 0x6d3   : > { %3148 = vpow2.f32 %v2300_v21 }
 0x6d4   : > { %3150 = vpow2.f32 %v2302_v62  ;;  %2925 = vmatprep.subr.bf16.mxu0 %v2924_v56  ;;  %v2296_v28 = vmul.f32 1.442695, %v2172_v7  ;;  %v2298_v37 = vmul.f32 1.442695, %v2173_v15 }
 0x6d5   : > { %2927 = vmatpush1.bf16.xpose.msra.mxu0 %v2926_v0  ;;  %3152 = vrcp.f32 %v2333_v23  ;;  %v2330_v16 = vpop.xlane.xlu0 %2329  ;;  %v4301_v23 = vld [vmem:[#allocation18_spill] sm:$0xff] }
 0x6d6   : > { %3154 = vpow2.f32 %v2296_v28  ;;  %v2339_v9 = vpop.xlane.xlu1 %2338 }
 0x6d7   : > { %3156 = vpow2.f32 %v2298_v37 }
 0x6d8   : > { %3158 = vrcp.f32 %v2330_v16 }
 0x6d9   : > { %3160 = vrcp.f32 %v2339_v9  ;;  %v2336_v44 = vpop.xlane.xlu0 %2335  ;;  %v2705_v9 = vld [vmem:[#allocation6] ss:$0 sm:$0xff] }
 0x6da   : > { %3162 = vrcp.f32 %v2336_v44  ;;  %v2345_v13 = vpop.xlane.xlu1 %2344 }
 0x6dd   : > { %v4158_v50 = vpop.eup %3148  ;;  %v2342_v24 = vpop.xlane.xlu0 %2341 }
 0x6de   : > { %v4160_v22 = vpop.eup %3150  ;;  %3164 = vrcp.f32 %v2342_v24  ;;  %v4181_v44 = vpop.f32.mrb[10].mxu1  ;;  %v4303_v24 = vld [vmem:[#allocation19_spill] sm:$0xff] }
 0x6df   : > { %v3153_v60 = vpop.eup %3152  ;;  %v2397_v48 = vadd.f32 %v4160_v22, %v4158_v50  ;;  %3166 = vrcp.f32 %v2345_v13  ;;  %v4183_v13 = vpop.f32.mrb[11].mxu1 }
 0x6e0   : > { %v4164_v10 = vpop.eup %3154  ;;  %v2451_v53 = vmul.f32 %v3153_v60, %v3968_v57  ;;  %v2450_v6 = vmul.f32 %v3153_v60, %v3964_v38 }
 0x6e1   : > { %v4166_v59 = vpop.eup %3156  ;;  %2398 = vadd.xlane.f32.xlu1 %v2397_v48 }
 0x6e2   : > { %v3159_v32 = vpop.eup %3158  ;;  %v2394_v46 = vadd.f32 %v4166_v59, %v4164_v10 }
 0x6e3   : > { %v3161_v2 = vpop.eup %3160  ;;  %v2449_v63 = vmul.f32 %v3159_v32, %v3978_v14  ;;  %v2448_v4 = vmul.f32 %v3159_v32, %v3976_v25 }
 0x6e4   : > { %v3163_v21 = vpop.eup %3162  ;;  %2395 = vadd.xlane.f32.xlu0 %v2394_v46  ;;  %v2455_v0 = vmul.f32 %v3161_v2, %v3986_v20  ;;  %v2454_v38 = vmul.f32 %v3161_v2, %v4301_v23  ;;  %v4302_v20 = vld [vmem:[#allocation20_spill] sm:$0xff] }
 0x6e5   : > { %v2928_v62 = vpack.c.bf16 %v2451_v53, %v2449_v63  ;;  %v2930_v49 = vpack.c.bf16 %v2450_v6, %v2448_v4  ;;  %v2453_v56 = vmul.f32 %v3163_v21, %v3990_v52  ;;  %v2452_v57 = vmul.f32 %v3163_v21, %v3988_v51 }
 0x6e7   : > { %2929 = vmatprep.subr.bf16.mxu0 %v2928_v62  ;;  %v2932_v7 = vpack.c.bf16 %v2455_v0, %v2453_v56  ;;  %v2934_v37 = vpack.c.bf16 %v2454_v38, %v2452_v57 }
 0x6e8   : > { %v3165_v15 = vpop.eup %3164  ;;  %2931 = vmatpush1.bf16.xpose.msra.mxu0 %v2930_v49 }
 0x6e9   : > { %2933 = vmatprep.subr.bf16.mxu0 %v2932_v7  ;;  %v3167_v14 = vpop.eup %3166  ;;  %v2457_v25 = vmul.f32 %v3165_v15, %v4004_v12  ;;  %v2456_v52 = vmul.f32 %v3165_v15, %v4302_v20  ;;  %v1704_v12 = vld [vmem:[%s4248_s12] sm:$0xff] }
 0x6ea   : > { %v2459_v28 = vmul.f32 %v3167_v14, %v3998_v17  ;;  %v2458_v51 = vmul.f32 %v3167_v14, %v4303_v24 }
 0x6ec   : > { %v2936_v16 = vpack.c.bf16 %v2459_v28, %v2457_v25  ;;  %v2938_v60 = vpack.c.bf16 %v2458_v51, %v2456_v52 }
 0x6f0   : > { %2935 = vmatpush1.bf16.xpose.msra.mxu0 %v2934_v37 }
 0x6f1   : > { %2937 = vmatprep.subr.bf16.mxu0 %v2936_v16 }
 0x6f2   : > { %2574 = vperm.xlu1 %3010, %v2705_v9  }
 0x6f8   : > { %2939 = vmatpush1.bf16.xpose.msra.mxu0 %v2938_v60 }
 0x6fa   : > { %1707 = vperm.xlu0 %3011, %v1704_v12  }
 0x70c   : > { %v2351_v17 = vpop.xlane.xlu1 %2350 }
 0x70d   : > { %3168 = vrcp.f32 %v2351_v17  ;;  %v4304_v17 = vld [vmem:[#allocation7_spill] sm:$0xff] }
 0x70e   : > { %v2348_v48 = vpop.xlane.xlu0 %2347 }
 0x70f   : > { %3170 = vrcp.f32 %v2348_v48 }
 0x712   : > { %v2354_v32 = vpop.xlane.xlu0 %2353  ;;  %v2357_v46 = vpop.xlane.xlu1 %2356 }
 0x713   : > { %3172 = vrcp.f32 %v2354_v32  ;;  %v4305_v32 = vld [vmem:[#allocation8_spill] sm:$0xff] }
 0x714   : > { %3174 = vrcp.f32 %v2357_v46 }
 0x716   : > { %v2360_v2 = vpop.xlane.xlu0 %2359  ;;  %v2363_v63 = vpop.xlane.xlu1 %2362 }
 0x717   : > { %v3169_v53 = vpop.eup %3168  ;;  %3176 = vrcp.f32 %v2360_v2  ;;  %v4306_v2 = vld [vmem:[#allocation10_spill] sm:$0xff] }
 0x718   : > { %3178 = vrcp.f32 %v2363_v63  ;;  %v2463_v4 = vmul.f32 %v3169_v53, %v4028_v18  ;;  %v2462_v6 = vmul.f32 %v3169_v53, %v4026_v47 }
 0x719   : > { %v3171_v21 = vpop.eup %3170 }
 0x71a   : > { %v2366_v62 = vpop.xlane.xlu0 %2365  ;;  %v2369_v49 = vpop.xlane.xlu1 %2368  ;;  %v2461_v56 = vmul.f32 %v3171_v21, %v4036_v1  ;;  %v2460_v0 = vmul.f32 %v3171_v21, %v4030_v31 }
 0x71b   : > { %3180 = vrcp.f32 %v2366_v62 }
 0x71c   : > { %v2940_v7 = vpack.c.bf16 %v2463_v4, %v2461_v56  ;;  %v2942_v15 = vpack.c.bf16 %v2462_v6, %v2460_v0  ;;  %3182 = vrcp.f32 %v2369_v49  ;;  %v4308_v4 = vld [vmem:[#allocation11_spill] sm:$0xff] }
 0x71d   : > { %v3173_v14 = vpop.eup %3172 }
 0x71e   : > { %v3175_v57 = vpop.eup %3174  ;;  %2941 = vmatprep.subr.bf16.mxu0 %v2940_v7  ;;  %v2465_v25 = vmul.f32 %v3173_v14, %v4044_v30  ;;  %v2372_v23 = vpop.xlane.xlu0 %2371  ;;  %v2464_v28 = vmul.f32 %v3173_v14, %v4040_v5 }
 0x71f   : > { %2943 = vmatpush1.bf16.xpose.msra.mxu0 %v2942_v15  ;;  %v2467_v18 = vmul.f32 %v3175_v57, %v4050_v26  ;;  %v2466_v1 = vmul.f32 %v3175_v57, %v4046_v19  ;;  %v2375_v37 = vpop.xlane.xlu1 %2374  ;;  %3184 = vrcp.f32 %v2372_v23 }
 0x720   : > { %3186 = vrcp.f32 %v2375_v37 }
 0x721   : > { %v3177_v47 = vpop.eup %3176  ;;  %v2944_v38 = vpack.c.bf16 %v2467_v18, %v2465_v25  ;;  %v2946_v30 = vpack.c.bf16 %v2466_v1, %v2464_v28 }
 0x722   : > { %v3179_v31 = vpop.eup %3178  ;;  %v2469_v16 = vmul.f32 %v3177_v47, %v4056_v58  ;;  %v2468_v24 = vmul.f32 %v3177_v47, %v4052_v27 }
 0x723   : > { %2945 = vmatprep.subr.bf16.mxu0 %v2944_v38  ;;  %v2471_v9 = vmul.f32 %v3179_v31, %v4062_v34  ;;  %v2470_v5 = vmul.f32 %v3179_v31, %v4058_v61 }
 0x725   : > { %v3181_v20 = vpop.eup %3180  ;;  %v2948_v52 = vpack.c.bf16 %v2471_v9, %v2469_v16  ;;  %v2950_v58 = vpack.c.bf16 %v2470_v5, %v2468_v24 }
 0x726   : > { %v3183_v26 = vpop.eup %3182  ;;  %v2473_v19 = vmul.f32 %v3181_v20, %v4068_v36  ;;  %v2472_v48 = vmul.f32 %v3181_v20, %v4304_v17  ;;  %v4307_v36 = vld [vmem:[#allocation9_spill] sm:$0xff] }
 0x727   : > { %2947 = vmatpush1.bf16.xpose.msra.mxu0 %v2946_v30  ;;  %v2475_v51 = vmul.f32 %v3183_v26, %v4074_v43  ;;  %v2474_v46 = vmul.f32 %v3183_v26, %v4305_v32  ;;  %v498_v17 = vld [vmem:[%s488_s25] sm:$0xff]  ;;  %v499_v32 = vld [vmem:[%s488_s25 + $0x8] sm:$0xff] }
 0x728   : > { %2949 = vmatprep.subr.bf16.mxu0 %v2948_v52 }
 0x729   : > { %v3185_v60 = vpop.eup %3184  ;;  %v2952_v12 = vpack.c.bf16 %v2475_v51, %v2473_v19  ;;  %v2954_v53 = vpack.c.bf16 %v2474_v46, %v2472_v48  ;;  %v3204_v48 = vld [vmem:[#allocation3] sm:$0xff]  ;;  %v3205_v46 = vld [vmem:[#allocation3 + $0x8] sm:$0xff] }
 0x72a   : > { %v3187_v34 = vpop.eup %3186  ;;  %v2477_v63 = vmul.f32 %v3185_v60, %v4306_v2  ;;  %v2476_v43 = vmul.f32 %v3185_v60, %v4307_v36 }
 0x72b   : > { %v2479_v27 = vmul.f32 %v3187_v34, %v4086_v29  ;;  %v2478_v6 = vmul.f32 %v3187_v34, %v4308_v4 }
 0x72d   : > { %v2956_v61 = vpack.c.bf16 %v2479_v27, %v2477_v63  ;;  %v2958_v21 = vpack.c.bf16 %v2478_v6, %v2476_v43 }
 0x72f   : > { %2951 = vmatpush1.bf16.xpose.msra.mxu0 %v2950_v58 }
 0x730   : > { %2953 = vmatprep.subr.bf16.mxu0 %v2952_v12 }
 0x737   : > { %2955 = vmatpush1.bf16.xpose.msra.mxu0 %v2954_v53 }
 0x738   : > { %2957 = vmatprep.subr.bf16.mxu0 %v2956_v61 }
 0x73f   : > { %2959 = vmatpush1.bf16.xpose.msra.mxu0 %v2958_v21 }
 0x74b   : > { %v2381_v62 = vpop.xlane.xlu1 %2380 }
 0x74c   : > { %3188 = vrcp.f32 %v2381_v62 }
 0x74e   : > { %v2378_v49 = vpop.xlane.xlu0 %2377 }
 0x74f   : > { %3190 = vrcp.f32 %v2378_v49 }
 0x753   : > { %v2387_v56 = vpop.xlane.xlu1 %2386 }
 0x754   : > { %3192 = vrcp.f32 %v2387_v56 }
 0x755   : > { %v2384_v0 = vpop.xlane.xlu0 %2383 }
 0x756   : > { %v3189_v7 = vpop.eup %3188  ;;  %3194 = vrcp.f32 %v2384_v0 }
 0x757   : > { %v2483_v29 = vmul.f32 %v3189_v7, %v4104_v39  ;;  %v2482_v15 = vmul.f32 %v3189_v7, %v4102_v42 }
 0x759   : > { %v3191_v14 = vpop.eup %3190 }
 0x75a   : > { %v2481_v57 = vmul.f32 %v3191_v14, %v4112_v33  ;;  %v2480_v25 = vmul.f32 %v3191_v14, %v4106_v54 }
 0x75b   : > { %v2393_v18 = vpop.xlane.xlu1 %2392 }
 0x75c   : > { %3196 = vrcp.f32 %v2393_v18  ;;  %v2960_v47 = vpack.c.bf16 %v2483_v29, %v2481_v57  ;;  %v2962_v23 = vpack.c.bf16 %v2482_v15, %v2480_v25 }
 0x75d   : > { %v2390_v38 = vpop.xlane.xlu0 %2389 }
 0x75e   : > { %v3193_v28 = vpop.eup %3192  ;;  %3198 = vrcp.f32 %v2390_v38  ;;  %2961 = vmatprep.subr.bf16.mxu0 %v2960_v47 }
 0x75f   : > { %2963 = vmatpush1.bf16.xpose.msra.mxu0 %v2962_v23  ;;  %v2487_v1 = vmul.f32 %v3193_v28, %v4124_v45  ;;  %v2486_v39 = vmul.f32 %v3193_v28, %v4122_v55 }
 0x760   : > { %v3195_v31 = vpop.eup %3194 }
 0x761   : > { %v2485_v42 = vmul.f32 %v3195_v31, %v4130_v35  ;;  %v2484_v33 = vmul.f32 %v3195_v31, %v4126_v8 }
 0x763   : > { %v2964_v37 = vpack.c.bf16 %v2487_v1, %v2485_v42  ;;  %v2966_v54 = vpack.c.bf16 %v2486_v39, %v2484_v33 }
 0x765   : > { %2965 = vmatprep.subr.bf16.mxu0 %v2964_v37 }
 0x766   : > { %v3197_v16 = vpop.eup %3196 }
 0x767   : > { %2967 = vmatpush1.bf16.xpose.msra.mxu0 %v2966_v54  ;;  %v2491_v9 = vmul.f32 %v3197_v16, %v4140_v40  ;;  %v2490_v30 = vmul.f32 %v3197_v16, %v4138_v3 }
 0x768   : > { %v3199_v20 = vpop.eup %3198 }
 0x769   : > { %v2489_v52 = vmul.f32 %v3199_v20, %v4146_v41  ;;  %v2488_v45 = vmul.f32 %v3199_v20, %v4142_v11 }
 0x76b   : > { %v2968_v55 = vpack.c.bf16 %v2491_v9, %v2489_v52  ;;  %v2970_v26 = vpack.c.bf16 %v2490_v30, %v2488_v45 }
 0x76d   : > { %2969 = vmatprep.subr.bf16.mxu0 %v2968_v55 }
 0x76e   : > { %v2399_v35 = vpop.xlane.xlu1 %2398 }
 0x76f   : > { %2971 = vmatpush1.bf16.xpose.msra.mxu0 %v2970_v26  ;;  %3200 = vrcp.f32 %v2399_v35 }
 0x771   : > { %v2396_v8 = vpop.xlane.xlu0 %2395 }
 0x772   : > { %3202 = vrcp.f32 %v2396_v8 }
 0x779   : > { %v1708_v24 = vpop.permute.xlu0 %1707  ;;  %v3201_v5 = vpop.eup %3200 }
 0x77a   : > { %v1782_v40 = vadd.f32 %v4183_v13, %v1708_v24  ;;  %v2495_v41 = vmul.f32 %v3201_v5, %v4160_v22  ;;  %v2494_v51 = vmul.f32 %v3201_v5, %v4158_v50  ;;  %v1780_v12 = vadd.f32 %v4181_v44, %v1708_v24  ;;  %v2575_v13 = vpop.permute.xlu1 %2574 }
 0x77c   : > { %v3203_v19 = vpop.eup %3202  ;;  %2560 = vmatprep.mubr.f32.mxu0 %v1782_v40 }
 0x77d   : > { %v2493_v3 = vmul.f32 %v3203_v19, %v4166_v59  ;;  %v2492_v11 = vmul.f32 %v3203_v19, %v4164_v10 }
 0x77f   : > { %v2972_v58 = vpack.c.bf16 %v2495_v41, %v2493_v3  ;;  %v2974_v60 = vpack.c.bf16 %v2494_v51, %v2492_v11 }
 0x781   : > { %2973 = vmatprep.subr.bf16.mxu0 %v2972_v58 }
 0x782   : > { %2975 = vmatpush1.bf16.xpose.msra.mxu0 %v2974_v60 }
 0x789   : > { %2561 = vmatmul.mubr.f32.vlgmr.msra.gmra.mrb[32].mxu0 %v1780_v12 }
 0x85c   : > { %v2562_v59 = vpop.f32.mrb[32].mxu0 }
 0x85d   : > { %v2577_v34 = vmul.f32 %v2575_v13, %v2562_v59  ;;  %v2564_v22 = vpop.f32.mrb[33].mxu0 }
 0x85e   : > { %v2578_v10 = vmul.f32 %v2575_v13, %v2564_v22 }
 0x85f   : > { %v2579_v50 = vadd.f32 %v3204_v48, %v2577_v34 }
 0x860   : > { %v2580_v2 = vadd.f32 %v3205_v46, %v2578_v10 }
 0x861   : > { %v2581_v63 = vadd.f32 %v2579_v50, %v498_v17 }
 0x862   : > { %v2582_v44 = vadd.f32 %v2580_v2, %v499_v32 }
 0x863   : > { %v2583_v27 = vmax.f32 %v2581_v63, 0.0 }
 0x864   : > { %v2584_v53 = vmax.f32 %v2582_v44, 0.0 }
 0x865   : > { %2585 = vst [vmem:[%s493_s8] sm:$0xff] %v2583_v27 }
 0x866   : > { %2586 = vst [vmem:[%s493_s8 + $0x8] sm:$0xff] %v2584_v53 }
 0x867 PF: > { %s30_s19 = sadd.s32 1, %s3212_s19  }
 0x868   : > { %p27_p4 = scmp.ge.s32.totalorder %s30_s19, 4  }
 0x86a   :  { %29 = sbr.rel (!%p27_p4) target bundleno = 4 (0x4), region = 109 }

</bundles_post_ra>
